<compile_context>
chip_gen: v7x
topology: tpu7x:2x2x1
jax: 0.10.0
libtpu: 0.0.40
codegen_flags: <defaults>
</compile_context>

<pallas_src>
import jax
import jax.numpy as jnp
from jax.experimental import pallas as pl
from jax.experimental.pallas import tpu as pltpu

# ---------------- scaled-down BERT config ----------------
VOCAB = 100          # stands in for bert-base 30522
TYPE_VOCAB = 2
MAX_POS = 16
HIDDEN = 64          # stands in for 768
N_HEADS = 2          # stands in for 12
HEAD_DIM = HIDDEN // N_HEADS
FFN = 128            # stands in for 3072
N_LAYERS = 2         # stands in for 12
GLOVE_VOCAB = 50
GLOVE_DIM = 32       # stands in for 300-d GloVe
N_LABELS = 2
PAD_ID = 0
UNK_WID = GLOVE_VOCAB            # appended all-zero GloVe row == '<unk>' / pad row
LN_EPS = 1e-12
ATTN_SCALE = 1.0 / float(HEAD_DIM) ** 0.5

_VMEM = pl.BlockSpec(memory_space=pltpu.MemorySpace.VMEM)


def _ln(x, gamma2d, beta2d):
    """LayerNorm over the last dim; gamma/beta are (1, H) rows."""
    mu = jnp.mean(x, axis=-1, keepdims=True)
    var = jnp.mean((x - mu) ** 2, axis=-1, keepdims=True)
    return (x - mu) * jax.lax.rsqrt(var + LN_EPS) * gamma2d + beta2d


# ---------------- the single fused forward kernel ----------------
def _make_net_kernel(B, S):
    def kernel(emb_ref, glove_ref, bias_ref,
               emb_ln_g_ref, emb_ln_b_ref,
               gate_w_ref, gate_b_ref, g2b_w_ref, g2b_b_ref,
               q_w_ref, q_b_ref, k_w_ref, k_b_ref, v_w_ref, v_b_ref,
               ao_w_ref, ao_b_ref, ln1_g_ref, ln1_b_ref,
               ff1_w_ref, ff1_b_ref, ff2_w_ref, ff2_b_ref,
               ln2_g_ref, ln2_b_ref,
               pool_w_ref, pool_b_ref, cls_w_ref, cls_b_ref,
               o_ref):
        # ---- bert.embeddings LayerNorm + GloVe gate mix  (b, a, g, o) ----
        emb = emb_ref[...].astype(jnp.float32)                       # (N, H)
        b_emb = _ln(emb, emb_ln_g_ref[...], emb_ln_b_ref[...])

        # gate(b).sigmoid(): HIDDEN -> 1 projection as a VPU multiply + lane
        # reduce (a 1-column MXU matmul would waste the array).
        z = jnp.sum(b_emb * gate_w_ref[...], axis=-1, keepdims=True) + gate_b_ref[...]
        a = 1.0 / (1.0 + jnp.exp(-z))                                 # (N, 1)

        # g = g2b(wvec[wids]) — bf16 MXU matmul, f32 accumulate
        g = jnp.dot(glove_ref[...].astype(jnp.bfloat16), g2b_w_ref[...],
                    preferred_element_type=jnp.float32) + g2b_b_ref[...]
        x = (1.0 - a) * b_emb + a * g                                 # (N, H) f32

        bias = bias_ref[...]                                          # (N, N) additive mask

        # ---- N_LAYERS fused encoder layers; weights stay VMEM-resident ----
        for l in range(N_LAYERS):
            xb = x.astype(jnp.bfloat16)
            acc = None
            # Per-head attention.  Head weights are indexed on leading dims
            # (static), so there are no 32-lane lane-axis slices in this loop.
            for h in range(N_HEADS):
                q = jnp.dot(xb, q_w_ref[l, h],
                            preferred_element_type=jnp.float32) + q_b_ref[l, h]
                k = jnp.dot(xb, k_w_ref[l, h],
                            preferred_element_type=jnp.float32) + k_b_ref[l, h]
                v = jnp.dot(xb, v_w_ref[l, h],
                            preferred_element_type=jnp.float32) + v_b_ref[l, h]

                # one (N, N) score block for the whole batch; cross-sequence
                # pairs and pad-key columns carry -1e4 in `bias`
                s = jax.lax.dot_general(q.astype(jnp.bfloat16), k.astype(jnp.bfloat16),
                                        (((1,), (1,)), ((), ())),
                                        preferred_element_type=jnp.float32)
                s = s * ATTN_SCALE + bias
                s = s - jnp.max(s, axis=-1, keepdims=True)
                p = jnp.exp(s)
                p = p * pl.reciprocal(jnp.sum(p, axis=-1, keepdims=True), approx=True)

                ctx = jnp.dot(p.astype(jnp.bfloat16), v.astype(jnp.bfloat16),
                              preferred_element_type=jnp.float32)     # (N, dH)
                # ctx @ Wo == sum_h ctx_h @ Wo_h  (avoids a lane concat)
                part = jnp.dot(ctx.astype(jnp.bfloat16), ao_w_ref[l, h],
                               preferred_element_type=jnp.float32)    # (N, H)
                acc = part if acc is None else acc + part

            attn_out = acc + ao_b_ref[l]
            h1 = _ln(attn_out + x, ln1_g_ref[l], ln1_b_ref[l])

            # FFN (gelu) + residual + LN2
            ff = jnp.dot(h1.astype(jnp.bfloat16), ff1_w_ref[l],
                         preferred_element_type=jnp.float32) + ff1_b_ref[l]
            # TODO(synk): tanh-approx GELU (BERT's exact gelu uses erf; <1e-3 diff)
            ff = 0.5 * ff * (1.0 + jnp.tanh(0.7978845608028654 *
                                            (ff + 0.044715 * ff * ff * ff)))
            ff2 = jnp.dot(ff.astype(jnp.bfloat16), ff2_w_ref[l],
                          preferred_element_type=jnp.float32) + ff2_b_ref[l]
            x = _ln(ff2 + h1, ln2_g_ref[l], ln2_b_ref[l])

        # ---- pooler (tanh dense on [CLS]) + classifier ----
        cls_rows = jnp.concatenate([x[bi * S:bi * S + 1, :] for bi in range(B)], axis=0)
        pooled = jnp.tanh(jnp.dot(cls_rows.astype(jnp.bfloat16), pool_w_ref[...],
                                  preferred_element_type=jnp.float32) + pool_b_ref[...])
        logits = jnp.dot(pooled.astype(jnp.bfloat16), cls_w_ref[...],
                         preferred_element_type=jnp.float32) + cls_b_ref[...]
        o_ref[...] = logits.astype(o_ref.dtype)

    return kernel


def net_kernel_call(params, emb, glove, bias, B, S):
    args = (
        emb, glove, bias,
        params["emb_ln_g"], params["emb_ln_b"],
        params["gate_w"], params["gate_b"], params["g2b_w"], params["g2b_b"],
        params["q_w"], params["q_b"], params["k_w"], params["k_b"],
        params["v_w"], params["v_b"],
        params["ao_w"], params["ao_b"], params["ln1_g"], params["ln1_b"],
        params["ff1_w"], params["ff1_b"], params["ff2_w"], params["ff2_b"],
        params["ln2_g"], params["ln2_b"],
        params["pool_w"], params["pool_b"], params["cls_w"], params["cls_b"],
    )
    return pl.pallas_call(
        _make_net_kernel(B, S),
        out_shape=jax.ShapeDtypeStruct((B, N_LABELS), jnp.float32),
        in_specs=[_VMEM] * len(args),
        out_specs=_VMEM,
    )(*args)


# ---------------- model params (MXU weights stored in bf16) ----------------
def init_params(key):
    def w(k, shape, scale=0.02, dtype=jnp.bfloat16):
        return (scale * jax.random.normal(k, shape, jnp.float32)).astype(dtype)

    keys = jax.random.split(key, 16)
    ki = iter(keys)
    p = {
        "word_emb": w(next(ki), (VOCAB, HIDDEN), dtype=jnp.float32),
        "pos_emb": w(next(ki), (MAX_POS, HIDDEN), dtype=jnp.float32),
        "type_emb": w(next(ki), (TYPE_VOCAB, HIDDEN), dtype=jnp.float32),
        "emb_ln_g": jnp.ones((1, HIDDEN), jnp.float32),
        "emb_ln_b": jnp.zeros((1, HIDDEN), jnp.float32),
        # wvec = cat([glove, zeros(1, D)]): index UNK_WID (== GLOVE_VOCAB) is the
        # all-zero row used for '<unk>' / padded positions.
        "wvec": jnp.concatenate(
            [0.1 * jax.random.normal(next(ki), (GLOVE_VOCAB, GLOVE_DIM), jnp.float32),
             jnp.zeros((1, GLOVE_DIM), jnp.float32)], axis=0),
        # gate = nn.Linear(768, 1): stored as a (1, HIDDEN) f32 row for the VPU path
        "gate_w": w(next(ki), (1, HIDDEN), dtype=jnp.float32),
        "gate_b": jnp.zeros((1, 1), jnp.float32),
        "g2b_w": w(next(ki), (GLOVE_DIM, HIDDEN)),                # nn.Linear(300, 768)
        "g2b_b": jnp.zeros((1, HIDDEN), jnp.float32),
        "pool_w": w(next(ki), (HIDDEN, HIDDEN)),
        "pool_b": jnp.zeros((1, HIDDEN), jnp.float32),
        "cls_w": w(next(ki), (HIDDEN, N_LABELS)),
        "cls_b": jnp.zeros((1, N_LABELS), jnp.float32),
        # Per-layer weights stacked on a leading layer axis; attention weights
        # additionally split per head on a leading head axis.
        "q_w": w(next(ki), (N_LAYERS, N_HEADS, HIDDEN, HEAD_DIM)),
        "q_b": jnp.zeros((N_LAYERS, N_HEADS, 1, HEAD_DIM), jnp.float32),
        "k_w": w(next(ki), (N_LAYERS, N_HEADS, HIDDEN, HEAD_DIM)),
        "k_b": jnp.zeros((N_LAYERS, N_HEADS, 1, HEAD_DIM), jnp.float32),
        "v_w": w(next(ki), (N_LAYERS, N_HEADS, HIDDEN, HEAD_DIM)),
        "v_b": jnp.zeros((N_LAYERS, N_HEADS, 1, HEAD_DIM), jnp.float32),
        "ao_w": w(next(ki), (N_LAYERS, N_HEADS, HEAD_DIM, HIDDEN)),
        "ao_b": jnp.zeros((N_LAYERS, 1, HIDDEN), jnp.float32),
        "ln1_g": jnp.ones((N_LAYERS, 1, HIDDEN), jnp.float32),
        "ln1_b": jnp.zeros((N_LAYERS, 1, HIDDEN), jnp.float32),
        "ff1_w": w(next(ki), (N_LAYERS, HIDDEN, FFN)),
        "ff1_b": jnp.zeros((N_LAYERS, 1, FFN), jnp.float32),
        "ff2_w": w(next(ki), (N_LAYERS, FFN, HIDDEN)),
        "ff2_b": jnp.zeros((N_LAYERS, 1, HIDDEN), jnp.float32),
        "ln2_g": jnp.ones((N_LAYERS, 1, HIDDEN), jnp.float32),
        "ln2_b": jnp.zeros((N_LAYERS, 1, HIDDEN), jnp.float32),
    }
    return p


# ---------------- forward (gathers / mask build in JAX glue, compute in ONE kernel) ----
@jax.jit
def net_forward(params, tknids, wids):
    B, S = tknids.shape
    N = B * S
    mask = (tknids != PAD_ID)                                      # (B, S) bool, True = real token

    # bert.embeddings(input_ids=tknids): table gathers in JAX glue, LN fused in-kernel
    we = jnp.take(params["word_emb"], tknids, axis=0)
    pe = params["pos_emb"][:S][None, :, :]
    te = params["type_emb"][0][None, None, :]                      # token_type_ids == 0
    emb = (we + pe + te).reshape(N, HIDDEN)

    glove = jnp.take(params["wvec"], wids, axis=0).reshape(N, GLOVE_DIM)

    # (N, N) additive attention mask: -1e4 on cross-sequence pairs and pad-key columns.
    # Numerically identical to per-sequence BERT masking, but lets the kernel run
    # one score block for the whole batch (no batch grid, fuller vregs).
    batch_ids = jnp.repeat(jnp.arange(B), S)
    attend_ok = (batch_ids[:, None] == batch_ids[None, :]) & mask.reshape(-1)[None, :]
    bias = jnp.where(attend_ok, 0.0, -10000.0).astype(jnp.float32)

    return net_kernel_call(params, emb, glove, bias, B, S)         # (B, N_LABELS)


if __name__ == "__main__":
    key = jax.random.PRNGKey(0)
    pkey, tkey, wkey = jax.random.split(key, 3)
    params = init_params(pkey)

    B, S = 2, 8
    # synthetic padded token ids (second sequence has 2 pad tokens -> mask test)
    tknids = jax.random.randint(tkey, (B, S), 1, VOCAB, dtype=jnp.int32)
    tknids = tknids.at[1, 6:].set(PAD_ID)
    # synthetic word ids into the GloVe table; pads map to the appended zero row
    wids = jax.random.randint(wkey, (B, S), 0, GLOVE_VOCAB, dtype=jnp.int32)
    wids = wids.at[1, 6:].set(UNK_WID)

    logits = net_forward(params, tknids, wids)
    jax.block_until_ready(logits)
    assert logits.shape == (B, N_LABELS) and logits.dtype == jnp.float32
    assert bool(jnp.all(jnp.isfinite(logits)))
    print("KERNEL_OK")
</pallas_src>

<mosaic_0001>
module attributes {stable_mosaic.version = 11 : i64} {
  func.func @kernel(%arg0: memref<16x64xf32, #tpu.memory_space<vmem>>, %arg1: memref<16x32xf32, #tpu.memory_space<vmem>>, %arg2: memref<16x16xf32, #tpu.memory_space<vmem>>, %arg3: memref<1x64xf32, #tpu.memory_space<vmem>>, %arg4: memref<1x64xf32, #tpu.memory_space<vmem>>, %arg5: memref<1x64xf32, #tpu.memory_space<vmem>>, %arg6: memref<1x1xf32, #tpu.memory_space<vmem>>, %arg7: memref<32x64xbf16, #tpu.memory_space<vmem>>, %arg8: memref<1x64xf32, #tpu.memory_space<vmem>>, %arg9: memref<2x2x64x32xbf16, #tpu.memory_space<vmem>>, %arg10: memref<2x2x1x32xf32, #tpu.memory_space<vmem>>, %arg11: memref<2x2x64x32xbf16, #tpu.memory_space<vmem>>, %arg12: memref<2x2x1x32xf32, #tpu.memory_space<vmem>>, %arg13: memref<2x2x64x32xbf16, #tpu.memory_space<vmem>>, %arg14: memref<2x2x1x32xf32, #tpu.memory_space<vmem>>, %arg15: memref<2x2x32x64xbf16, #tpu.memory_space<vmem>>, %arg16: memref<2x1x64xf32, #tpu.memory_space<vmem>>, %arg17: memref<2x1x64xf32, #tpu.memory_space<vmem>>, %arg18: memref<2x1x64xf32, #tpu.memory_space<vmem>>, %arg19: memref<2x64x128xbf16, #tpu.memory_space<vmem>>, %arg20: memref<2x1x128xf32, #tpu.memory_space<vmem>>, %arg21: memref<2x128x64xbf16, #tpu.memory_space<vmem>>, %arg22: memref<2x1x64xf32, #tpu.memory_space<vmem>>, %arg23: memref<2x1x64xf32, #tpu.memory_space<vmem>>, %arg24: memref<2x1x64xf32, #tpu.memory_space<vmem>>, %arg25: memref<64x64xbf16, #tpu.memory_space<vmem>>, %arg26: memref<1x64xf32, #tpu.memory_space<vmem>>, %arg27: memref<64x2xbf16, #tpu.memory_space<vmem>>, %arg28: memref<1x2xf32, #tpu.memory_space<vmem>>, %arg29: memref<2x2xf32, #tpu.memory_space<vmem>>) attributes {dimension_semantics = [], scalar_prefetch = 0 : i64, scratch_operands = 0 : i64, tpu.core_type = #tpu.core_type<tc>} {
    %c0 = arith.constant 0 : index
    %c0_0 = arith.constant 0 : index
    %0 = vector.load %arg0[%c0, %c0_0] : memref<16x64xf32, #tpu.memory_space<vmem>>, vector<16x64xf32>
    %c0_1 = arith.constant 0 : index
    %c0_2 = arith.constant 0 : index
    %1 = vector.load %arg3[%c0_1, %c0_2] : memref<1x64xf32, #tpu.memory_space<vmem>>, vector<1x64xf32>
    %c0_3 = arith.constant 0 : index
    %c0_4 = arith.constant 0 : index
    %2 = vector.load %arg4[%c0_3, %c0_4] : memref<1x64xf32, #tpu.memory_space<vmem>>, vector<1x64xf32>
    %cst = arith.constant dense<0.000000e+00> : vector<16xf32>
    %3 = vector.multi_reduction <add>, %0, %cst [1] : vector<16x64xf32> to vector<16xf32>
    %4 = vector.shape_cast %3 : vector<16xf32> to vector<16x1xf32>
    %cst_5 = arith.constant 6.400000e+01 : f32
    %5 = vector.broadcast %cst_5 : f32 to vector<16x1xf32>
    %6 = arith.divf %4, %5 : vector<16x1xf32>
    %7 = vector.broadcast %6 : vector<16x1xf32> to vector<16x64xf32>
    %8 = arith.subf %0, %7 : vector<16x64xf32>
    %9 = arith.mulf %8, %8 : vector<16x64xf32>
    %cst_6 = arith.constant dense<0.000000e+00> : vector<16xf32>
    %10 = vector.multi_reduction <add>, %9, %cst_6 [1] : vector<16x64xf32> to vector<16xf32>
    %11 = vector.shape_cast %10 : vector<16xf32> to vector<16x1xf32>
    %cst_7 = arith.constant 6.400000e+01 : f32
    %12 = vector.broadcast %cst_7 : f32 to vector<16x1xf32>
    %13 = arith.divf %11, %12 : vector<16x1xf32>
    %14 = vector.broadcast %6 : vector<16x1xf32> to vector<16x64xf32>
    %15 = arith.subf %0, %14 : vector<16x64xf32>
    %cst_8 = arith.constant 9.99999996E-13 : f32
    %16 = vector.broadcast %cst_8 : f32 to vector<16x1xf32>
    %17 = arith.addf %13, %16 : vector<16x1xf32>
    %18 = math.rsqrt %17 : vector<16x1xf32>
    %19 = vector.broadcast %18 : vector<16x1xf32> to vector<16x64xf32>
    %20 = arith.mulf %15, %19 : vector<16x64xf32>
    %21 = vector.broadcast %1 : vector<1x64xf32> to vector<16x64xf32>
    %22 = arith.mulf %20, %21 : vector<16x64xf32>
    %23 = vector.broadcast %2 : vector<1x64xf32> to vector<16x64xf32>
    %24 = arith.addf %22, %23 : vector<16x64xf32>
    %c0_9 = arith.constant 0 : index
    %c0_10 = arith.constant 0 : index
    %25 = vector.load %arg5[%c0_9, %c0_10] : memref<1x64xf32, #tpu.memory_space<vmem>>, vector<1x64xf32>
    %26 = vector.broadcast %25 : vector<1x64xf32> to vector<16x64xf32>
    %27 = arith.mulf %24, %26 : vector<16x64xf32>
    %cst_11 = arith.constant dense<0.000000e+00> : vector<16xf32>
    %28 = vector.multi_reduction <add>, %27, %cst_11 [1] : vector<16x64xf32> to vector<16xf32>
    %29 = vector.shape_cast %28 : vector<16xf32> to vector<16x1xf32>
    %c0_12 = arith.constant 0 : index
    %c0_13 = arith.constant 0 : index
    %30 = vector.load %arg6[%c0_12, %c0_13] : memref<1x1xf32, #tpu.memory_space<vmem>>, vector<1x1xf32>
    %31 = vector.broadcast %30 : vector<1x1xf32> to vector<16x1xf32>
    %32 = arith.addf %29, %31 : vector<16x1xf32>
    %cst_14 = arith.constant 0.000000e+00 : f32
    %33 = vector.broadcast %cst_14 : f32 to vector<16x1xf32>
    %34 = arith.subf %33, %32 : vector<16x1xf32>
    %35 = math.exp %34 : vector<16x1xf32>
    %cst_15 = arith.constant 1.000000e+00 : f32
    %36 = vector.broadcast %cst_15 : f32 to vector<16x1xf32>
    %37 = arith.addf %36, %35 : vector<16x1xf32>
    %cst_16 = arith.constant 1.000000e+00 : f32
    %38 = vector.broadcast %cst_16 : f32 to vector<16x1xf32>
    %39 = arith.divf %38, %37 : vector<16x1xf32>
    %c0_17 = arith.constant 0 : index
    %c0_18 = arith.constant 0 : index
    %40 = vector.load %arg1[%c0_17, %c0_18] : memref<16x32xf32, #tpu.memory_space<vmem>>, vector<16x32xf32>
    %41 = arith.truncf %40 : vector<16x32xf32> to vector<16x32xbf16>
    %c0_19 = arith.constant 0 : index
    %c0_20 = arith.constant 0 : index
    %42 = vector.load %arg7[%c0_19, %c0_20] : memref<32x64xbf16, #tpu.memory_space<vmem>>, vector<32x64xbf16>
    %cst_21 = arith.constant dense<0.000000e+00> : vector<16x64xf32>
    %43 = tpu.matmul %41, %42, %cst_21 {dimension_numbers = #tpu.dot_dimension_numbers<[1], [0], [0], [1], [0, 0, 1, 1], [], []>} : vector<16x32xbf16>, vector<32x64xbf16>, vector<16x64xf32> -> vector<16x64xf32>
    %c0_22 = arith.constant 0 : index
    %c0_23 = arith.constant 0 : index
    %44 = vector.load %arg8[%c0_22, %c0_23] : memref<1x64xf32, #tpu.memory_space<vmem>>, vector<1x64xf32>
    %45 = vector.broadcast %44 : vector<1x64xf32> to vector<16x64xf32>
    %46 = arith.addf %43, %45 : vector<16x64xf32>
    %cst_24 = arith.constant 1.000000e+00 : f32
    %47 = vector.broadcast %cst_24 : f32 to vector<16x1xf32>
    %48 = arith.subf %47, %39 : vector<16x1xf32>
    %49 = vector.broadcast %48 : vector<16x1xf32> to vector<16x64xf32>
    %50 = arith.mulf %49, %24 : vector<16x64xf32>
    %51 = vector.broadcast %39 : vector<16x1xf32> to vector<16x64xf32>
    %52 = arith.mulf %51, %46 : vector<16x64xf32>
    %53 = arith.addf %50, %52 : vector<16x64xf32>
    %c0_25 = arith.constant 0 : index
    %c0_26 = arith.constant 0 : index
    %54 = vector.load %arg2[%c0_25, %c0_26] : memref<16x16xf32, #tpu.memory_space<vmem>>, vector<16x16xf32>
    %55 = arith.truncf %53 : vector<16x64xf32> to vector<16x64xbf16>
    %c0_27 = arith.constant 0 : index
    %c0_28 = arith.constant 0 : index
    %c0_29 = arith.constant 0 : index
    %c0_30 = arith.constant 0 : index
    %56 = vector.load %arg9[%c0_27, %c0_28, %c0_29, %c0_30] : memref<2x2x64x32xbf16, #tpu.memory_space<vmem>>, vector<1x1x64x32xbf16>
    %57 = vector.shape_cast %56 : vector<1x1x64x32xbf16> to vector<64x32xbf16>
    %cst_31 = arith.constant dense<0.000000e+00> : vector<16x32xf32>
    %58 = tpu.matmul %55, %57, %cst_31 {dimension_numbers = #tpu.dot_dimension_numbers<[1], [0], [0], [1], [0, 0, 1, 1], [], []>} : vector<16x64xbf16>, vector<64x32xbf16>, vector<16x32xf32> -> vector<16x32xf32>
    %c0_32 = arith.constant 0 : index
    %c0_33 = arith.constant 0 : index
    %c0_34 = arith.constant 0 : index
    %c0_35 = arith.constant 0 : index
    %59 = vector.load %arg10[%c0_32, %c0_33, %c0_34, %c0_35] : memref<2x2x1x32xf32, #tpu.memory_space<vmem>>, vector<1x1x1x32xf32>
    %60 = vector.shape_cast %59 : vector<1x1x1x32xf32> to vector<1x32xf32>
    %61 = vector.broadcast %60 : vector<1x32xf32> to vector<16x32xf32>
    %62 = arith.addf %58, %61 : vector<16x32xf32>
    %c0_36 = arith.constant 0 : index
    %c0_37 = arith.constant 0 : index
    %c0_38 = arith.constant 0 : index
    %c0_39 = arith.constant 0 : index
    %63 = vector.load %arg11[%c0_36, %c0_37, %c0_38, %c0_39] : memref<2x2x64x32xbf16, #tpu.memory_space<vmem>>, vector<1x1x64x32xbf16>
    %64 = vector.shape_cast %63 : vector<1x1x64x32xbf16> to vector<64x32xbf16>
    %cst_40 = arith.constant dense<0.000000e+00> : vector<16x32xf32>
    %65 = tpu.matmul %55, %64, %cst_40 {dimension_numbers = #tpu.dot_dimension_numbers<[1], [0], [0], [1], [0, 0, 1, 1], [], []>} : vector<16x64xbf16>, vector<64x32xbf16>, vector<16x32xf32> -> vector<16x32xf32>
    %c0_41 = arith.constant 0 : index
    %c0_42 = arith.constant 0 : index
    %c0_43 = arith.constant 0 : index
    %c0_44 = arith.constant 0 : index
    %66 = vector.load %arg12[%c0_41, %c0_42, %c0_43, %c0_44] : memref<2x2x1x32xf32, #tpu.memory_space<vmem>>, vector<1x1x1x32xf32>
    %67 = vector.shape_cast %66 : vector<1x1x1x32xf32> to vector<1x32xf32>
    %68 = vector.broadcast %67 : vector<1x32xf32> to vector<16x32xf32>
    %69 = arith.addf %65, %68 : vector<16x32xf32>
    %c0_45 = arith.constant 0 : index
    %c0_46 = arith.constant 0 : index
    %c0_47 = arith.constant 0 : index
    %c0_48 = arith.constant 0 : index
    %70 = vector.load %arg13[%c0_45, %c0_46, %c0_47, %c0_48] : memref<2x2x64x32xbf16, #tpu.memory_space<vmem>>, vector<1x1x64x32xbf16>
    %71 = vector.shape_cast %70 : vector<1x1x64x32xbf16> to vector<64x32xbf16>
    %cst_49 = arith.constant dense<0.000000e+00> : vector<16x32xf32>
    %72 = tpu.matmul %55, %71, %cst_49 {dimension_numbers = #tpu.dot_dimension_numbers<[1], [0], [0], [1], [0, 0, 1, 1], [], []>} : vector<16x64xbf16>, vector<64x32xbf16>, vector<16x32xf32> -> vector<16x32xf32>
    %c0_50 = arith.constant 0 : index
    %c0_51 = arith.constant 0 : index
    %c0_52 = arith.constant 0 : index
    %c0_53 = arith.constant 0 : index
    %73 = vector.load %arg14[%c0_50, %c0_51, %c0_52, %c0_53] : memref<2x2x1x32xf32, #tpu.memory_space<vmem>>, vector<1x1x1x32xf32>
    %74 = vector.shape_cast %73 : vector<1x1x1x32xf32> to vector<1x32xf32>
    %75 = vector.broadcast %74 : vector<1x32xf32> to vector<16x32xf32>
    %76 = arith.addf %72, %75 : vector<16x32xf32>
    %77 = arith.truncf %62 : vector<16x32xf32> to vector<16x32xbf16>
    %78 = arith.truncf %69 : vector<16x32xf32> to vector<16x32xbf16>
    %cst_54 = arith.constant dense<0.000000e+00> : vector<16x16xf32>
    %79 = tpu.matmul %77, %78, %cst_54 {dimension_numbers = #tpu.dot_dimension_numbers<[1], [1], [0], [0], [0, 0, 1, 0], [], []>} : vector<16x32xbf16>, vector<16x32xbf16>, vector<16x16xf32> -> vector<16x16xf32>
    %cst_55 = arith.constant 0.176776692 : f32
    %80 = vector.broadcast %cst_55 : f32 to vector<16x16xf32>
    %81 = arith.mulf %79, %80 : vector<16x16xf32>
    %82 = arith.addf %81, %54 : vector<16x16xf32>
    %cst_56 = arith.constant dense<0xFF800000> : vector<16xf32>
    %83 = vector.multi_reduction <maximumf>, %82, %cst_56 [1] : vector<16x16xf32> to vector<16xf32>
    %84 = vector.shape_cast %83 : vector<16xf32> to vector<16x1xf32>
    %85 = vector.broadcast %84 : vector<16x1xf32> to vector<16x16xf32>
    %86 = arith.subf %82, %85 : vector<16x16xf32>
    %87 = math.exp %86 : vector<16x16xf32>
    %cst_57 = arith.constant dense<0.000000e+00> : vector<16xf32>
    %88 = vector.multi_reduction <add>, %87, %cst_57 [1] : vector<16x16xf32> to vector<16xf32>
    %89 = vector.shape_cast %88 : vector<16xf32> to vector<16x1xf32>
    %90 = tpu.reciprocal %89 {approx = true} : vector<16x1xf32> -> vector<16x1xf32>
    %91 = vector.broadcast %90 : vector<16x1xf32> to vector<16x16xf32>
    %92 = arith.mulf %87, %91 : vector<16x16xf32>
    %93 = arith.truncf %92 : vector<16x16xf32> to vector<16x16xbf16>
    %94 = arith.truncf %76 : vector<16x32xf32> to vector<16x32xbf16>
    %cst_58 = arith.constant dense<0.000000e+00> : vector<16x32xf32>
    %95 = tpu.matmul %93, %94, %cst_58 {dimension_numbers = #tpu.dot_dimension_numbers<[1], [0], [0], [1], [0, 0, 1, 1], [], []>} : vector<16x16xbf16>, vector<16x32xbf16>, vector<16x32xf32> -> vector<16x32xf32>
    %96 = arith.truncf %95 : vector<16x32xf32> to vector<16x32xbf16>
    %c0_59 = arith.constant 0 : index
    %c0_60 = arith.constant 0 : index
    %c0_61 = arith.constant 0 : index
    %c0_62 = arith.constant 0 : index
    %97 = vector.load %arg15[%c0_59, %c0_60, %c0_61, %c0_62] : memref<2x2x32x64xbf16, #tpu.memory_space<vmem>>, vector<1x1x32x64xbf16>
    %98 = vector.shape_cast %97 : vector<1x1x32x64xbf16> to vector<32x64xbf16>
    %cst_63 = arith.constant dense<0.000000e+00> : vector<16x64xf32>
    %99 = tpu.matmul %96, %98, %cst_63 {dimension_numbers = #tpu.dot_dimension_numbers<[1], [0], [0], [1], [0, 0, 1, 1], [], []>} : vector<16x32xbf16>, vector<32x64xbf16>, vector<16x64xf32> -> vector<16x64xf32>
    %c0_64 = arith.constant 0 : index
    %c1 = arith.constant 1 : index
    %c0_65 = arith.constant 0 : index
    %c0_66 = arith.constant 0 : index
    %100 = vector.load %arg9[%c0_64, %c1, %c0_65, %c0_66] : memref<2x2x64x32xbf16, #tpu.memory_space<vmem>>, vector<1x1x64x32xbf16>
    %101 = vector.shape_cast %100 : vector<1x1x64x32xbf16> to vector<64x32xbf16>
    %cst_67 = arith.constant dense<0.000000e+00> : vector<16x32xf32>
    %102 = tpu.matmul %55, %101, %cst_67 {dimension_numbers = #tpu.dot_dimension_numbers<[1], [0], [0], [1], [0, 0, 1, 1], [], []>} : vector<16x64xbf16>, vector<64x32xbf16>, vector<16x32xf32> -> vector<16x32xf32>
    %c0_68 = arith.constant 0 : index
    %c1_69 = arith.constant 1 : index
    %c0_70 = arith.constant 0 : index
    %c0_71 = arith.constant 0 : index
    %103 = vector.load %arg10[%c0_68, %c1_69, %c0_70, %c0_71] : memref<2x2x1x32xf32, #tpu.memory_space<vmem>>, vector<1x1x1x32xf32>
    %104 = vector.shape_cast %103 : vector<1x1x1x32xf32> to vector<1x32xf32>
    %105 = vector.broadcast %104 : vector<1x32xf32> to vector<16x32xf32>
    %106 = arith.addf %102, %105 : vector<16x32xf32>
    %c0_72 = arith.constant 0 : index
    %c1_73 = arith.constant 1 : index
    %c0_74 = arith.constant 0 : index
    %c0_75 = arith.constant 0 : index
    %107 = vector.load %arg11[%c0_72, %c1_73, %c0_74, %c0_75] : memref<2x2x64x32xbf16, #tpu.memory_space<vmem>>, vector<1x1x64x32xbf16>
    %108 = vector.shape_cast %107 : vector<1x1x64x32xbf16> to vector<64x32xbf16>
    %cst_76 = arith.constant dense<0.000000e+00> : vector<16x32xf32>
    %109 = tpu.matmul %55, %108, %cst_76 {dimension_numbers = #tpu.dot_dimension_numbers<[1], [0], [0], [1], [0, 0, 1, 1], [], []>} : vector<16x64xbf16>, vector<64x32xbf16>, vector<16x32xf32> -> vector<16x32xf32>
    %c0_77 = arith.constant 0 : index
    %c1_78 = arith.constant 1 : index
    %c0_79 = arith.constant 0 : index
    %c0_80 = arith.constant 0 : index
    %110 = vector.load %arg12[%c0_77, %c1_78, %c0_79, %c0_80] : memref<2x2x1x32xf32, #tpu.memory_space<vmem>>, vector<1x1x1x32xf32>
    %111 = vector.shape_cast %110 : vector<1x1x1x32xf32> to vector<1x32xf32>
    %112 = vector.broadcast %111 : vector<1x32xf32> to vector<16x32xf32>
    %113 = arith.addf %109, %112 : vector<16x32xf32>
    %c0_81 = arith.constant 0 : index
    %c1_82 = arith.constant 1 : index
    %c0_83 = arith.constant 0 : index
    %c0_84 = arith.constant 0 : index
    %114 = vector.load %arg13[%c0_81, %c1_82, %c0_83, %c0_84] : memref<2x2x64x32xbf16, #tpu.memory_space<vmem>>, vector<1x1x64x32xbf16>
    %115 = vector.shape_cast %114 : vector<1x1x64x32xbf16> to vector<64x32xbf16>
    %cst_85 = arith.constant dense<0.000000e+00> : vector<16x32xf32>
    %116 = tpu.matmul %55, %115, %cst_85 {dimension_numbers = #tpu.dot_dimension_numbers<[1], [0], [0], [1], [0, 0, 1, 1], [], []>} : vector<16x64xbf16>, vector<64x32xbf16>, vector<16x32xf32> -> vector<16x32xf32>
    %c0_86 = arith.constant 0 : index
    %c1_87 = arith.constant 1 : index
    %c0_88 = arith.constant 0 : index
    %c0_89 = arith.constant 0 : index
    %117 = vector.load %arg14[%c0_86, %c1_87, %c0_88, %c0_89] : memref<2x2x1x32xf32, #tpu.memory_space<vmem>>, vector<1x1x1x32xf32>
    %118 = vector.shape_cast %117 : vector<1x1x1x32xf32> to vector<1x32xf32>
    %119 = vector.broadcast %118 : vector<1x32xf32> to vector<16x32xf32>
    %120 = arith.addf %116, %119 : vector<16x32xf32>
    %121 = arith.truncf %106 : vector<16x32xf32> to vector<16x32xbf16>
    %122 = arith.truncf %113 : vector<16x32xf32> to vector<16x32xbf16>
    %cst_90 = arith.constant dense<0.000000e+00> : vector<16x16xf32>
    %123 = tpu.matmul %121, %122, %cst_90 {dimension_numbers = #tpu.dot_dimension_numbers<[1], [1], [0], [0], [0, 0, 1, 0], [], []>} : vector<16x32xbf16>, vector<16x32xbf16>, vector<16x16xf32> -> vector<16x16xf32>
    %cst_91 = arith.constant 0.176776692 : f32
    %124 = vector.broadcast %cst_91 : f32 to vector<16x16xf32>
    %125 = arith.mulf %123, %124 : vector<16x16xf32>
    %126 = arith.addf %125, %54 : vector<16x16xf32>
    %cst_92 = arith.constant dense<0xFF800000> : vector<16xf32>
    %127 = vector.multi_reduction <maximumf>, %126, %cst_92 [1] : vector<16x16xf32> to vector<16xf32>
    %128 = vector.shape_cast %127 : vector<16xf32> to vector<16x1xf32>
    %129 = vector.broadcast %128 : vector<16x1xf32> to vector<16x16xf32>
    %130 = arith.subf %126, %129 : vector<16x16xf32>
    %131 = math.exp %130 : vector<16x16xf32>
    %cst_93 = arith.constant dense<0.000000e+00> : vector<16xf32>
    %132 = vector.multi_reduction <add>, %131, %cst_93 [1] : vector<16x16xf32> to vector<16xf32>
    %133 = vector.shape_cast %132 : vector<16xf32> to vector<16x1xf32>
    %134 = tpu.reciprocal %133 {approx = true} : vector<16x1xf32> -> vector<16x1xf32>
    %135 = vector.broadcast %134 : vector<16x1xf32> to vector<16x16xf32>
    %136 = arith.mulf %131, %135 : vector<16x16xf32>
    %137 = arith.truncf %136 : vector<16x16xf32> to vector<16x16xbf16>
    %138 = arith.truncf %120 : vector<16x32xf32> to vector<16x32xbf16>
    %cst_94 = arith.constant dense<0.000000e+00> : vector<16x32xf32>
    %139 = tpu.matmul %137, %138, %cst_94 {dimension_numbers = #tpu.dot_dimension_numbers<[1], [0], [0], [1], [0, 0, 1, 1], [], []>} : vector<16x16xbf16>, vector<16x32xbf16>, vector<16x32xf32> -> vector<16x32xf32>
    %140 = arith.truncf %139 : vector<16x32xf32> to vector<16x32xbf16>
    %c0_95 = arith.constant 0 : index
    %c1_96 = arith.constant 1 : index
    %c0_97 = arith.constant 0 : index
    %c0_98 = arith.constant 0 : index
    %141 = vector.load %arg15[%c0_95, %c1_96, %c0_97, %c0_98] : memref<2x2x32x64xbf16, #tpu.memory_space<vmem>>, vector<1x1x32x64xbf16>
    %142 = vector.shape_cast %141 : vector<1x1x32x64xbf16> to vector<32x64xbf16>
    %cst_99 = arith.constant dense<0.000000e+00> : vector<16x64xf32>
    %143 = tpu.matmul %140, %142, %cst_99 {dimension_numbers = #tpu.dot_dimension_numbers<[1], [0], [0], [1], [0, 0, 1, 1], [], []>} : vector<16x32xbf16>, vector<32x64xbf16>, vector<16x64xf32> -> vector<16x64xf32>
    %144 = arith.addf %99, %143 : vector<16x64xf32>
    %c0_100 = arith.constant 0 : index
    %c0_101 = arith.constant 0 : index
    %c0_102 = arith.constant 0 : index
    %145 = vector.load %arg16[%c0_100, %c0_101, %c0_102] : memref<2x1x64xf32, #tpu.memory_space<vmem>>, vector<1x1x64xf32>
    %146 = vector.shape_cast %145 : vector<1x1x64xf32> to vector<1x64xf32>
    %147 = vector.broadcast %146 : vector<1x64xf32> to vector<16x64xf32>
    %148 = arith.addf %144, %147 : vector<16x64xf32>
    %149 = arith.addf %148, %53 : vector<16x64xf32>
    %c0_103 = arith.constant 0 : index
    %c0_104 = arith.constant 0 : index
    %c0_105 = arith.constant 0 : index
    %150 = vector.load %arg17[%c0_103, %c0_104, %c0_105] : memref<2x1x64xf32, #tpu.memory_space<vmem>>, vector<1x1x64xf32>
    %151 = vector.shape_cast %150 : vector<1x1x64xf32> to vector<1x64xf32>
    %c0_106 = arith.constant 0 : index
    %c0_107 = arith.constant 0 : index
    %c0_108 = arith.constant 0 : index
    %152 = vector.load %arg18[%c0_106, %c0_107, %c0_108] : memref<2x1x64xf32, #tpu.memory_space<vmem>>, vector<1x1x64xf32>
    %153 = vector.shape_cast %152 : vector<1x1x64xf32> to vector<1x64xf32>
    %cst_109 = arith.constant dense<0.000000e+00> : vector<16xf32>
    %154 = vector.multi_reduction <add>, %149, %cst_109 [1] : vector<16x64xf32> to vector<16xf32>
    %155 = vector.shape_cast %154 : vector<16xf32> to vector<16x1xf32>
    %cst_110 = arith.constant 6.400000e+01 : f32
    %156 = vector.broadcast %cst_110 : f32 to vector<16x1xf32>
    %157 = arith.divf %155, %156 : vector<16x1xf32>
    %158 = vector.broadcast %157 : vector<16x1xf32> to vector<16x64xf32>
    %159 = arith.subf %149, %158 : vector<16x64xf32>
    %160 = arith.mulf %159, %159 : vector<16x64xf32>
    %cst_111 = arith.constant dense<0.000000e+00> : vector<16xf32>
    %161 = vector.multi_reduction <add>, %160, %cst_111 [1] : vector<16x64xf32> to vector<16xf32>
    %162 = vector.shape_cast %161 : vector<16xf32> to vector<16x1xf32>
    %cst_112 = arith.constant 6.400000e+01 : f32
    %163 = vector.broadcast %cst_112 : f32 to vector<16x1xf32>
    %164 = arith.divf %162, %163 : vector<16x1xf32>
    %165 = vector.broadcast %157 : vector<16x1xf32> to vector<16x64xf32>
    %166 = arith.subf %149, %165 : vector<16x64xf32>
    %cst_113 = arith.constant 9.99999996E-13 : f32
    %167 = vector.broadcast %cst_113 : f32 to vector<16x1xf32>
    %168 = arith.addf %164, %167 : vector<16x1xf32>
    %169 = math.rsqrt %168 : vector<16x1xf32>
    %170 = vector.broadcast %169 : vector<16x1xf32> to vector<16x64xf32>
    %171 = arith.mulf %166, %170 : vector<16x64xf32>
    %172 = vector.broadcast %151 : vector<1x64xf32> to vector<16x64xf32>
    %173 = arith.mulf %171, %172 : vector<16x64xf32>
    %174 = vector.broadcast %153 : vector<1x64xf32> to vector<16x64xf32>
    %175 = arith.addf %173, %174 : vector<16x64xf32>
    %176 = arith.truncf %175 : vector<16x64xf32> to vector<16x64xbf16>
    %c0_114 = arith.constant 0 : index
    %c0_115 = arith.constant 0 : index
    %c0_116 = arith.constant 0 : index
    %177 = vector.load %arg19[%c0_114, %c0_115, %c0_116] : memref<2x64x128xbf16, #tpu.memory_space<vmem>>, vector<1x64x128xbf16>
    %178 = vector.shape_cast %177 : vector<1x64x128xbf16> to vector<64x128xbf16>
    %cst_117 = arith.constant dense<0.000000e+00> : vector<16x128xf32>
    %179 = tpu.matmul %176, %178, %cst_117 {dimension_numbers = #tpu.dot_dimension_numbers<[1], [0], [0], [1], [0, 0, 1, 1], [], []>} : vector<16x64xbf16>, vector<64x128xbf16>, vector<16x128xf32> -> vector<16x128xf32>
    %c0_118 = arith.constant 0 : index
    %c0_119 = arith.constant 0 : index
    %c0_120 = arith.constant 0 : index
    %180 = vector.load %arg20[%c0_118, %c0_119, %c0_120] : memref<2x1x128xf32, #tpu.memory_space<vmem>>, vector<1x1x128xf32>
    %181 = vector.shape_cast %180 : vector<1x1x128xf32> to vector<1x128xf32>
    %182 = vector.broadcast %181 : vector<1x128xf32> to vector<16x128xf32>
    %183 = arith.addf %179, %182 : vector<16x128xf32>
    %cst_121 = arith.constant 5.000000e-01 : f32
    %184 = vector.broadcast %cst_121 : f32 to vector<16x128xf32>
    %185 = arith.mulf %184, %183 : vector<16x128xf32>
    %cst_122 = arith.constant 4.471500e-02 : f32
    %186 = vector.broadcast %cst_122 : f32 to vector<16x128xf32>
    %187 = arith.mulf %186, %183 : vector<16x128xf32>
    %188 = arith.mulf %187, %183 : vector<16x128xf32>
    %189 = arith.mulf %188, %183 : vector<16x128xf32>
    %190 = arith.addf %183, %189 : vector<16x128xf32>
    %cst_123 = arith.constant 0.797884583 : f32
    %191 = vector.broadcast %cst_123 : f32 to vector<16x128xf32>
    %192 = arith.mulf %191, %190 : vector<16x128xf32>
    %193 = math.tanh %192 : vector<16x128xf32>
    %cst_124 = arith.constant 1.000000e+00 : f32
    %194 = vector.broadcast %cst_124 : f32 to vector<16x128xf32>
    %195 = arith.addf %194, %193 : vector<16x128xf32>
    %196 = arith.mulf %185, %195 : vector<16x128xf32>
    %197 = arith.truncf %196 : vector<16x128xf32> to vector<16x128xbf16>
    %c0_125 = arith.constant 0 : index
    %c0_126 = arith.constant 0 : index
    %c0_127 = arith.constant 0 : index
    %198 = vector.load %arg21[%c0_125, %c0_126, %c0_127] : memref<2x128x64xbf16, #tpu.memory_space<vmem>>, vector<1x128x64xbf16>
    %199 = vector.shape_cast %198 : vector<1x128x64xbf16> to vector<128x64xbf16>
    %cst_128 = arith.constant dense<0.000000e+00> : vector<16x64xf32>
    %200 = tpu.matmul %197, %199, %cst_128 {dimension_numbers = #tpu.dot_dimension_numbers<[1], [0], [0], [1], [0, 0, 1, 1], [], []>} : vector<16x128xbf16>, vector<128x64xbf16>, vector<16x64xf32> -> vector<16x64xf32>
    %c0_129 = arith.constant 0 : index
    %c0_130 = arith.constant 0 : index
    %c0_131 = arith.constant 0 : index
    %201 = vector.load %arg22[%c0_129, %c0_130, %c0_131] : memref<2x1x64xf32, #tpu.memory_space<vmem>>, vector<1x1x64xf32>
    %202 = vector.shape_cast %201 : vector<1x1x64xf32> to vector<1x64xf32>
    %203 = vector.broadcast %202 : vector<1x64xf32> to vector<16x64xf32>
    %204 = arith.addf %200, %203 : vector<16x64xf32>
    %205 = arith.addf %204, %175 : vector<16x64xf32>
    %c0_132 = arith.constant 0 : index
    %c0_133 = arith.constant 0 : index
    %c0_134 = arith.constant 0 : index
    %206 = vector.load %arg23[%c0_132, %c0_133, %c0_134] : memref<2x1x64xf32, #tpu.memory_space<vmem>>, vector<1x1x64xf32>
    %207 = vector.shape_cast %206 : vector<1x1x64xf32> to vector<1x64xf32>
    %c0_135 = arith.constant 0 : index
    %c0_136 = arith.constant 0 : index
    %c0_137 = arith.constant 0 : index
    %208 = vector.load %arg24[%c0_135, %c0_136, %c0_137] : memref<2x1x64xf32, #tpu.memory_space<vmem>>, vector<1x1x64xf32>
    %209 = vector.shape_cast %208 : vector<1x1x64xf32> to vector<1x64xf32>
    %cst_138 = arith.constant dense<0.000000e+00> : vector<16xf32>
    %210 = vector.multi_reduction <add>, %205, %cst_138 [1] : vector<16x64xf32> to vector<16xf32>
    %211 = vector.shape_cast %210 : vector<16xf32> to vector<16x1xf32>
    %cst_139 = arith.constant 6.400000e+01 : f32
    %212 = vector.broadcast %cst_139 : f32 to vector<16x1xf32>
    %213 = arith.divf %211, %212 : vector<16x1xf32>
    %214 = vector.broadcast %213 : vector<16x1xf32> to vector<16x64xf32>
    %215 = arith.subf %205, %214 : vector<16x64xf32>
    %216 = arith.mulf %215, %215 : vector<16x64xf32>
    %cst_140 = arith.constant dense<0.000000e+00> : vector<16xf32>
    %217 = vector.multi_reduction <add>, %216, %cst_140 [1] : vector<16x64xf32> to vector<16xf32>
    %218 = vector.shape_cast %217 : vector<16xf32> to vector<16x1xf32>
    %cst_141 = arith.constant 6.400000e+01 : f32
    %219 = vector.broadcast %cst_141 : f32 to vector<16x1xf32>
    %220 = arith.divf %218, %219 : vector<16x1xf32>
    %221 = vector.broadcast %213 : vector<16x1xf32> to vector<16x64xf32>
    %222 = arith.subf %205, %221 : vector<16x64xf32>
    %cst_142 = arith.constant 9.99999996E-13 : f32
    %223 = vector.broadcast %cst_142 : f32 to vector<16x1xf32>
    %224 = arith.addf %220, %223 : vector<16x1xf32>
    %225 = math.rsqrt %224 : vector<16x1xf32>
    %226 = vector.broadcast %225 : vector<16x1xf32> to vector<16x64xf32>
    %227 = arith.mulf %222, %226 : vector<16x64xf32>
    %228 = vector.broadcast %207 : vector<1x64xf32> to vector<16x64xf32>
    %229 = arith.mulf %227, %228 : vector<16x64xf32>
    %230 = vector.broadcast %209 : vector<1x64xf32> to vector<16x64xf32>
    %231 = arith.addf %229, %230 : vector<16x64xf32>
    %232 = arith.truncf %231 : vector<16x64xf32> to vector<16x64xbf16>
    %c1_143 = arith.constant 1 : index
    %c0_144 = arith.constant 0 : index
    %c0_145 = arith.constant 0 : index
    %c0_146 = arith.constant 0 : index
    %233 = vector.load %arg9[%c1_143, %c0_144, %c0_145, %c0_146] : memref<2x2x64x32xbf16, #tpu.memory_space<vmem>>, vector<1x1x64x32xbf16>
    %234 = vector.shape_cast %233 : vector<1x1x64x32xbf16> to vector<64x32xbf16>
    %cst_147 = arith.constant dense<0.000000e+00> : vector<16x32xf32>
    %235 = tpu.matmul %232, %234, %cst_147 {dimension_numbers = #tpu.dot_dimension_numbers<[1], [0], [0], [1], [0, 0, 1, 1], [], []>} : vector<16x64xbf16>, vector<64x32xbf16>, vector<16x32xf32> -> vector<16x32xf32>
    %c1_148 = arith.constant 1 : index
    %c0_149 = arith.constant 0 : index
    %c0_150 = arith.constant 0 : index
    %c0_151 = arith.constant 0 : index
    %236 = vector.load %arg10[%c1_148, %c0_149, %c0_150, %c0_151] : memref<2x2x1x32xf32, #tpu.memory_space<vmem>>, vector<1x1x1x32xf32>
    %237 = vector.shape_cast %236 : vector<1x1x1x32xf32> to vector<1x32xf32>
    %238 = vector.broadcast %237 : vector<1x32xf32> to vector<16x32xf32>
    %239 = arith.addf %235, %238 : vector<16x32xf32>
    %c1_152 = arith.constant 1 : index
    %c0_153 = arith.constant 0 : index
    %c0_154 = arith.constant 0 : index
    %c0_155 = arith.constant 0 : index
    %240 = vector.load %arg11[%c1_152, %c0_153, %c0_154, %c0_155] : memref<2x2x64x32xbf16, #tpu.memory_space<vmem>>, vector<1x1x64x32xbf16>
    %241 = vector.shape_cast %240 : vector<1x1x64x32xbf16> to vector<64x32xbf16>
    %cst_156 = arith.constant dense<0.000000e+00> : vector<16x32xf32>
    %242 = tpu.matmul %232, %241, %cst_156 {dimension_numbers = #tpu.dot_dimension_numbers<[1], [0], [0], [1], [0, 0, 1, 1], [], []>} : vector<16x64xbf16>, vector<64x32xbf16>, vector<16x32xf32> -> vector<16x32xf32>
    %c1_157 = arith.constant 1 : index
    %c0_158 = arith.constant 0 : index
    %c0_159 = arith.constant 0 : index
    %c0_160 = arith.constant 0 : index
    %243 = vector.load %arg12[%c1_157, %c0_158, %c0_159, %c0_160] : memref<2x2x1x32xf32, #tpu.memory_space<vmem>>, vector<1x1x1x32xf32>
    %244 = vector.shape_cast %243 : vector<1x1x1x32xf32> to vector<1x32xf32>
    %245 = vector.broadcast %244 : vector<1x32xf32> to vector<16x32xf32>
    %246 = arith.addf %242, %245 : vector<16x32xf32>
    %c1_161 = arith.constant 1 : index
    %c0_162 = arith.constant 0 : index
    %c0_163 = arith.constant 0 : index
    %c0_164 = arith.constant 0 : index
    %247 = vector.load %arg13[%c1_161, %c0_162, %c0_163, %c0_164] : memref<2x2x64x32xbf16, #tpu.memory_space<vmem>>, vector<1x1x64x32xbf16>
    %248 = vector.shape_cast %247 : vector<1x1x64x32xbf16> to vector<64x32xbf16>
    %cst_165 = arith.constant dense<0.000000e+00> : vector<16x32xf32>
    %249 = tpu.matmul %232, %248, %cst_165 {dimension_numbers = #tpu.dot_dimension_numbers<[1], [0], [0], [1], [0, 0, 1, 1], [], []>} : vector<16x64xbf16>, vector<64x32xbf16>, vector<16x32xf32> -> vector<16x32xf32>
    %c1_166 = arith.constant 1 : index
    %c0_167 = arith.constant 0 : index
    %c0_168 = arith.constant 0 : index
    %c0_169 = arith.constant 0 : index
    %250 = vector.load %arg14[%c1_166, %c0_167, %c0_168, %c0_169] : memref<2x2x1x32xf32, #tpu.memory_space<vmem>>, vector<1x1x1x32xf32>
    %251 = vector.shape_cast %250 : vector<1x1x1x32xf32> to vector<1x32xf32>
    %252 = vector.broadcast %251 : vector<1x32xf32> to vector<16x32xf32>
    %253 = arith.addf %249, %252 : vector<16x32xf32>
    %254 = arith.truncf %239 : vector<16x32xf32> to vector<16x32xbf16>
    %255 = arith.truncf %246 : vector<16x32xf32> to vector<16x32xbf16>
    %cst_170 = arith.constant dense<0.000000e+00> : vector<16x16xf32>
    %256 = tpu.matmul %254, %255, %cst_170 {dimension_numbers = #tpu.dot_dimension_numbers<[1], [1], [0], [0], [0, 0, 1, 0], [], []>} : vector<16x32xbf16>, vector<16x32xbf16>, vector<16x16xf32> -> vector<16x16xf32>
    %cst_171 = arith.constant 0.176776692 : f32
    %257 = vector.broadcast %cst_171 : f32 to vector<16x16xf32>
    %258 = arith.mulf %256, %257 : vector<16x16xf32>
    %259 = arith.addf %258, %54 : vector<16x16xf32>
    %cst_172 = arith.constant dense<0xFF800000> : vector<16xf32>
    %260 = vector.multi_reduction <maximumf>, %259, %cst_172 [1] : vector<16x16xf32> to vector<16xf32>
    %261 = vector.shape_cast %260 : vector<16xf32> to vector<16x1xf32>
    %262 = vector.broadcast %261 : vector<16x1xf32> to vector<16x16xf32>
    %263 = arith.subf %259, %262 : vector<16x16xf32>
    %264 = math.exp %263 : vector<16x16xf32>
    %cst_173 = arith.constant dense<0.000000e+00> : vector<16xf32>
    %265 = vector.multi_reduction <add>, %264, %cst_173 [1] : vector<16x16xf32> to vector<16xf32>
    %266 = vector.shape_cast %265 : vector<16xf32> to vector<16x1xf32>
    %267 = tpu.reciprocal %266 {approx = true} : vector<16x1xf32> -> vector<16x1xf32>
    %268 = vector.broadcast %267 : vector<16x1xf32> to vector<16x16xf32>
    %269 = arith.mulf %264, %268 : vector<16x16xf32>
    %270 = arith.truncf %269 : vector<16x16xf32> to vector<16x16xbf16>
    %271 = arith.truncf %253 : vector<16x32xf32> to vector<16x32xbf16>
    %cst_174 = arith.constant dense<0.000000e+00> : vector<16x32xf32>
    %272 = tpu.matmul %270, %271, %cst_174 {dimension_numbers = #tpu.dot_dimension_numbers<[1], [0], [0], [1], [0, 0, 1, 1], [], []>} : vector<16x16xbf16>, vector<16x32xbf16>, vector<16x32xf32> -> vector<16x32xf32>
    %273 = arith.truncf %272 : vector<16x32xf32> to vector<16x32xbf16>
    %c1_175 = arith.constant 1 : index
    %c0_176 = arith.constant 0 : index
    %c0_177 = arith.constant 0 : index
    %c0_178 = arith.constant 0 : index
    %274 = vector.load %arg15[%c1_175, %c0_176, %c0_177, %c0_178] : memref<2x2x32x64xbf16, #tpu.memory_space<vmem>>, vector<1x1x32x64xbf16>
    %275 = vector.shape_cast %274 : vector<1x1x32x64xbf16> to vector<32x64xbf16>
    %cst_179 = arith.constant dense<0.000000e+00> : vector<16x64xf32>
    %276 = tpu.matmul %273, %275, %cst_179 {dimension_numbers = #tpu.dot_dimension_numbers<[1], [0], [0], [1], [0, 0, 1, 1], [], []>} : vector<16x32xbf16>, vector<32x64xbf16>, vector<16x64xf32> -> vector<16x64xf32>
    %c1_180 = arith.constant 1 : index
    %c1_181 = arith.constant 1 : index
    %c0_182 = arith.constant 0 : index
    %c0_183 = arith.constant 0 : index
    %277 = vector.load %arg9[%c1_180, %c1_181, %c0_182, %c0_183] : memref<2x2x64x32xbf16, #tpu.memory_space<vmem>>, vector<1x1x64x32xbf16>
    %278 = vector.shape_cast %277 : vector<1x1x64x32xbf16> to vector<64x32xbf16>
    %cst_184 = arith.constant dense<0.000000e+00> : vector<16x32xf32>
    %279 = tpu.matmul %232, %278, %cst_184 {dimension_numbers = #tpu.dot_dimension_numbers<[1], [0], [0], [1], [0, 0, 1, 1], [], []>} : vector<16x64xbf16>, vector<64x32xbf16>, vector<16x32xf32> -> vector<16x32xf32>
    %c1_185 = arith.constant 1 : index
    %c1_186 = arith.constant 1 : index
    %c0_187 = arith.constant 0 : index
    %c0_188 = arith.constant 0 : index
    %280 = vector.load %arg10[%c1_185, %c1_186, %c0_187, %c0_188] : memref<2x2x1x32xf32, #tpu.memory_space<vmem>>, vector<1x1x1x32xf32>
    %281 = vector.shape_cast %280 : vector<1x1x1x32xf32> to vector<1x32xf32>
    %282 = vector.broadcast %281 : vector<1x32xf32> to vector<16x32xf32>
    %283 = arith.addf %279, %282 : vector<16x32xf32>
    %c1_189 = arith.constant 1 : index
    %c1_190 = arith.constant 1 : index
    %c0_191 = arith.constant 0 : index
    %c0_192 = arith.constant 0 : index
    %284 = vector.load %arg11[%c1_189, %c1_190, %c0_191, %c0_192] : memref<2x2x64x32xbf16, #tpu.memory_space<vmem>>, vector<1x1x64x32xbf16>
    %285 = vector.shape_cast %284 : vector<1x1x64x32xbf16> to vector<64x32xbf16>
    %cst_193 = arith.constant dense<0.000000e+00> : vector<16x32xf32>
    %286 = tpu.matmul %232, %285, %cst_193 {dimension_numbers = #tpu.dot_dimension_numbers<[1], [0], [0], [1], [0, 0, 1, 1], [], []>} : vector<16x64xbf16>, vector<64x32xbf16>, vector<16x32xf32> -> vector<16x32xf32>
    %c1_194 = arith.constant 1 : index
    %c1_195 = arith.constant 1 : index
    %c0_196 = arith.constant 0 : index
    %c0_197 = arith.constant 0 : index
    %287 = vector.load %arg12[%c1_194, %c1_195, %c0_196, %c0_197] : memref<2x2x1x32xf32, #tpu.memory_space<vmem>>, vector<1x1x1x32xf32>
    %288 = vector.shape_cast %287 : vector<1x1x1x32xf32> to vector<1x32xf32>
    %289 = vector.broadcast %288 : vector<1x32xf32> to vector<16x32xf32>
    %290 = arith.addf %286, %289 : vector<16x32xf32>
    %c1_198 = arith.constant 1 : index
    %c1_199 = arith.constant 1 : index
    %c0_200 = arith.constant 0 : index
    %c0_201 = arith.constant 0 : index
    %291 = vector.load %arg13[%c1_198, %c1_199, %c0_200, %c0_201] : memref<2x2x64x32xbf16, #tpu.memory_space<vmem>>, vector<1x1x64x32xbf16>
    %292 = vector.shape_cast %291 : vector<1x1x64x32xbf16> to vector<64x32xbf16>
    %cst_202 = arith.constant dense<0.000000e+00> : vector<16x32xf32>
    %293 = tpu.matmul %232, %292, %cst_202 {dimension_numbers = #tpu.dot_dimension_numbers<[1], [0], [0], [1], [0, 0, 1, 1], [], []>} : vector<16x64xbf16>, vector<64x32xbf16>, vector<16x32xf32> -> vector<16x32xf32>
    %c1_203 = arith.constant 1 : index
    %c1_204 = arith.constant 1 : index
    %c0_205 = arith.constant 0 : index
    %c0_206 = arith.constant 0 : index
    %294 = vector.load %arg14[%c1_203, %c1_204, %c0_205, %c0_206] : memref<2x2x1x32xf32, #tpu.memory_space<vmem>>, vector<1x1x1x32xf32>
    %295 = vector.shape_cast %294 : vector<1x1x1x32xf32> to vector<1x32xf32>
    %296 = vector.broadcast %295 : vector<1x32xf32> to vector<16x32xf32>
    %297 = arith.addf %293, %296 : vector<16x32xf32>
    %298 = arith.truncf %283 : vector<16x32xf32> to vector<16x32xbf16>
    %299 = arith.truncf %290 : vector<16x32xf32> to vector<16x32xbf16>
    %cst_207 = arith.constant dense<0.000000e+00> : vector<16x16xf32>
    %300 = tpu.matmul %298, %299, %cst_207 {dimension_numbers = #tpu.dot_dimension_numbers<[1], [1], [0], [0], [0, 0, 1, 0], [], []>} : vector<16x32xbf16>, vector<16x32xbf16>, vector<16x16xf32> -> vector<16x16xf32>
    %cst_208 = arith.constant 0.176776692 : f32
    %301 = vector.broadcast %cst_208 : f32 to vector<16x16xf32>
    %302 = arith.mulf %300, %301 : vector<16x16xf32>
    %303 = arith.addf %302, %54 : vector<16x16xf32>
    %cst_209 = arith.constant dense<0xFF800000> : vector<16xf32>
    %304 = vector.multi_reduction <maximumf>, %303, %cst_209 [1] : vector<16x16xf32> to vector<16xf32>
    %305 = vector.shape_cast %304 : vector<16xf32> to vector<16x1xf32>
    %306 = vector.broadcast %305 : vector<16x1xf32> to vector<16x16xf32>
    %307 = arith.subf %303, %306 : vector<16x16xf32>
    %308 = math.exp %307 : vector<16x16xf32>
    %cst_210 = arith.constant dense<0.000000e+00> : vector<16xf32>
    %309 = vector.multi_reduction <add>, %308, %cst_210 [1] : vector<16x16xf32> to vector<16xf32>
    %310 = vector.shape_cast %309 : vector<16xf32> to vector<16x1xf32>
    %311 = tpu.reciprocal %310 {approx = true} : vector<16x1xf32> -> vector<16x1xf32>
    %312 = vector.broadcast %311 : vector<16x1xf32> to vector<16x16xf32>
    %313 = arith.mulf %308, %312 : vector<16x16xf32>
    %314 = arith.truncf %313 : vector<16x16xf32> to vector<16x16xbf16>
    %315 = arith.truncf %297 : vector<16x32xf32> to vector<16x32xbf16>
    %cst_211 = arith.constant dense<0.000000e+00> : vector<16x32xf32>
    %316 = tpu.matmul %314, %315, %cst_211 {dimension_numbers = #tpu.dot_dimension_numbers<[1], [0], [0], [1], [0, 0, 1, 1], [], []>} : vector<16x16xbf16>, vector<16x32xbf16>, vector<16x32xf32> -> vector<16x32xf32>
    %317 = arith.truncf %316 : vector<16x32xf32> to vector<16x32xbf16>
    %c1_212 = arith.constant 1 : index
    %c1_213 = arith.constant 1 : index
    %c0_214 = arith.constant 0 : index
    %c0_215 = arith.constant 0 : index
    %318 = vector.load %arg15[%c1_212, %c1_213, %c0_214, %c0_215] : memref<2x2x32x64xbf16, #tpu.memory_space<vmem>>, vector<1x1x32x64xbf16>
    %319 = vector.shape_cast %318 : vector<1x1x32x64xbf16> to vector<32x64xbf16>
    %cst_216 = arith.constant dense<0.000000e+00> : vector<16x64xf32>
    %320 = tpu.matmul %317, %319, %cst_216 {dimension_numbers = #tpu.dot_dimension_numbers<[1], [0], [0], [1], [0, 0, 1, 1], [], []>} : vector<16x32xbf16>, vector<32x64xbf16>, vector<16x64xf32> -> vector<16x64xf32>
    %321 = arith.addf %276, %320 : vector<16x64xf32>
    %c1_217 = arith.constant 1 : index
    %c0_218 = arith.constant 0 : index
    %c0_219 = arith.constant 0 : index
    %322 = vector.load %arg16[%c1_217, %c0_218, %c0_219] : memref<2x1x64xf32, #tpu.memory_space<vmem>>, vector<1x1x64xf32>
    %323 = vector.shape_cast %322 : vector<1x1x64xf32> to vector<1x64xf32>
    %324 = vector.broadcast %323 : vector<1x64xf32> to vector<16x64xf32>
    %325 = arith.addf %321, %324 : vector<16x64xf32>
    %326 = arith.addf %325, %231 : vector<16x64xf32>
    %c1_220 = arith.constant 1 : index
    %c0_221 = arith.constant 0 : index
    %c0_222 = arith.constant 0 : index
    %327 = vector.load %arg17[%c1_220, %c0_221, %c0_222] : memref<2x1x64xf32, #tpu.memory_space<vmem>>, vector<1x1x64xf32>
    %328 = vector.shape_cast %327 : vector<1x1x64xf32> to vector<1x64xf32>
    %c1_223 = arith.constant 1 : index
    %c0_224 = arith.constant 0 : index
    %c0_225 = arith.constant 0 : index
    %329 = vector.load %arg18[%c1_223, %c0_224, %c0_225] : memref<2x1x64xf32, #tpu.memory_space<vmem>>, vector<1x1x64xf32>
    %330 = vector.shape_cast %329 : vector<1x1x64xf32> to vector<1x64xf32>
    %cst_226 = arith.constant dense<0.000000e+00> : vector<16xf32>
    %331 = vector.multi_reduction <add>, %326, %cst_226 [1] : vector<16x64xf32> to vector<16xf32>
    %332 = vector.shape_cast %331 : vector<16xf32> to vector<16x1xf32>
    %cst_227 = arith.constant 6.400000e+01 : f32
    %333 = vector.broadcast %cst_227 : f32 to vector<16x1xf32>
    %334 = arith.divf %332, %333 : vector<16x1xf32>
    %335 = vector.broadcast %334 : vector<16x1xf32> to vector<16x64xf32>
    %336 = arith.subf %326, %335 : vector<16x64xf32>
    %337 = arith.mulf %336, %336 : vector<16x64xf32>
    %cst_228 = arith.constant dense<0.000000e+00> : vector<16xf32>
    %338 = vector.multi_reduction <add>, %337, %cst_228 [1] : vector<16x64xf32> to vector<16xf32>
    %339 = vector.shape_cast %338 : vector<16xf32> to vector<16x1xf32>
    %cst_229 = arith.constant 6.400000e+01 : f32
    %340 = vector.broadcast %cst_229 : f32 to vector<16x1xf32>
    %341 = arith.divf %339, %340 : vector<16x1xf32>
    %342 = vector.broadcast %334 : vector<16x1xf32> to vector<16x64xf32>
    %343 = arith.subf %326, %342 : vector<16x64xf32>
    %cst_230 = arith.constant 9.99999996E-13 : f32
    %344 = vector.broadcast %cst_230 : f32 to vector<16x1xf32>
    %345 = arith.addf %341, %344 : vector<16x1xf32>
    %346 = math.rsqrt %345 : vector<16x1xf32>
    %347 = vector.broadcast %346 : vector<16x1xf32> to vector<16x64xf32>
    %348 = arith.mulf %343, %347 : vector<16x64xf32>
    %349 = vector.broadcast %328 : vector<1x64xf32> to vector<16x64xf32>
    %350 = arith.mulf %348, %349 : vector<16x64xf32>
    %351 = vector.broadcast %330 : vector<1x64xf32> to vector<16x64xf32>
    %352 = arith.addf %350, %351 : vector<16x64xf32>
    %353 = arith.truncf %352 : vector<16x64xf32> to vector<16x64xbf16>
    %c1_231 = arith.constant 1 : index
    %c0_232 = arith.constant 0 : index
    %c0_233 = arith.constant 0 : index
    %354 = vector.load %arg19[%c1_231, %c0_232, %c0_233] : memref<2x64x128xbf16, #tpu.memory_space<vmem>>, vector<1x64x128xbf16>
    %355 = vector.shape_cast %354 : vector<1x64x128xbf16> to vector<64x128xbf16>
    %cst_234 = arith.constant dense<0.000000e+00> : vector<16x128xf32>
    %356 = tpu.matmul %353, %355, %cst_234 {dimension_numbers = #tpu.dot_dimension_numbers<[1], [0], [0], [1], [0, 0, 1, 1], [], []>} : vector<16x64xbf16>, vector<64x128xbf16>, vector<16x128xf32> -> vector<16x128xf32>
    %c1_235 = arith.constant 1 : index
    %c0_236 = arith.constant 0 : index
    %c0_237 = arith.constant 0 : index
    %357 = vector.load %arg20[%c1_235, %c0_236, %c0_237] : memref<2x1x128xf32, #tpu.memory_space<vmem>>, vector<1x1x128xf32>
    %358 = vector.shape_cast %357 : vector<1x1x128xf32> to vector<1x128xf32>
    %359 = vector.broadcast %358 : vector<1x128xf32> to vector<16x128xf32>
    %360 = arith.addf %356, %359 : vector<16x128xf32>
    %cst_238 = arith.constant 5.000000e-01 : f32
    %361 = vector.broadcast %cst_238 : f32 to vector<16x128xf32>
    %362 = arith.mulf %361, %360 : vector<16x128xf32>
    %cst_239 = arith.constant 4.471500e-02 : f32
    %363 = vector.broadcast %cst_239 : f32 to vector<16x128xf32>
    %364 = arith.mulf %363, %360 : vector<16x128xf32>
    %365 = arith.mulf %364, %360 : vector<16x128xf32>
    %366 = arith.mulf %365, %360 : vector<16x128xf32>
    %367 = arith.addf %360, %366 : vector<16x128xf32>
    %cst_240 = arith.constant 0.797884583 : f32
    %368 = vector.broadcast %cst_240 : f32 to vector<16x128xf32>
    %369 = arith.mulf %368, %367 : vector<16x128xf32>
    %370 = math.tanh %369 : vector<16x128xf32>
    %cst_241 = arith.constant 1.000000e+00 : f32
    %371 = vector.broadcast %cst_241 : f32 to vector<16x128xf32>
    %372 = arith.addf %371, %370 : vector<16x128xf32>
    %373 = arith.mulf %362, %372 : vector<16x128xf32>
    %374 = arith.truncf %373 : vector<16x128xf32> to vector<16x128xbf16>
    %c1_242 = arith.constant 1 : index
    %c0_243 = arith.constant 0 : index
    %c0_244 = arith.constant 0 : index
    %375 = vector.load %arg21[%c1_242, %c0_243, %c0_244] : memref<2x128x64xbf16, #tpu.memory_space<vmem>>, vector<1x128x64xbf16>
    %376 = vector.shape_cast %375 : vector<1x128x64xbf16> to vector<128x64xbf16>
    %cst_245 = arith.constant dense<0.000000e+00> : vector<16x64xf32>
    %377 = tpu.matmul %374, %376, %cst_245 {dimension_numbers = #tpu.dot_dimension_numbers<[1], [0], [0], [1], [0, 0, 1, 1], [], []>} : vector<16x128xbf16>, vector<128x64xbf16>, vector<16x64xf32> -> vector<16x64xf32>
    %c1_246 = arith.constant 1 : index
    %c0_247 = arith.constant 0 : index
    %c0_248 = arith.constant 0 : index
    %378 = vector.load %arg22[%c1_246, %c0_247, %c0_248] : memref<2x1x64xf32, #tpu.memory_space<vmem>>, vector<1x1x64xf32>
    %379 = vector.shape_cast %378 : vector<1x1x64xf32> to vector<1x64xf32>
    %380 = vector.broadcast %379 : vector<1x64xf32> to vector<16x64xf32>
    %381 = arith.addf %377, %380 : vector<16x64xf32>
    %382 = arith.addf %381, %352 : vector<16x64xf32>
    %c1_249 = arith.constant 1 : index
    %c0_250 = arith.constant 0 : index
    %c0_251 = arith.constant 0 : index
    %383 = vector.load %arg23[%c1_249, %c0_250, %c0_251] : memref<2x1x64xf32, #tpu.memory_space<vmem>>, vector<1x1x64xf32>
    %384 = vector.shape_cast %383 : vector<1x1x64xf32> to vector<1x64xf32>
    %c1_252 = arith.constant 1 : index
    %c0_253 = arith.constant 0 : index
    %c0_254 = arith.constant 0 : index
    %385 = vector.load %arg24[%c1_252, %c0_253, %c0_254] : memref<2x1x64xf32, #tpu.memory_space<vmem>>, vector<1x1x64xf32>
    %386 = vector.shape_cast %385 : vector<1x1x64xf32> to vector<1x64xf32>
    %cst_255 = arith.constant dense<0.000000e+00> : vector<16xf32>
    %387 = vector.multi_reduction <add>, %382, %cst_255 [1] : vector<16x64xf32> to vector<16xf32>
    %388 = vector.shape_cast %387 : vector<16xf32> to vector<16x1xf32>
    %cst_256 = arith.constant 6.400000e+01 : f32
    %389 = vector.broadcast %cst_256 : f32 to vector<16x1xf32>
    %390 = arith.divf %388, %389 : vector<16x1xf32>
    %391 = vector.broadcast %390 : vector<16x1xf32> to vector<16x64xf32>
    %392 = arith.subf %382, %391 : vector<16x64xf32>
    %393 = arith.mulf %392, %392 : vector<16x64xf32>
    %cst_257 = arith.constant dense<0.000000e+00> : vector<16xf32>
    %394 = vector.multi_reduction <add>, %393, %cst_257 [1] : vector<16x64xf32> to vector<16xf32>
    %395 = vector.shape_cast %394 : vector<16xf32> to vector<16x1xf32>
    %cst_258 = arith.constant 6.400000e+01 : f32
    %396 = vector.broadcast %cst_258 : f32 to vector<16x1xf32>
    %397 = arith.divf %395, %396 : vector<16x1xf32>
    %398 = vector.broadcast %390 : vector<16x1xf32> to vector<16x64xf32>
    %399 = arith.subf %382, %398 : vector<16x64xf32>
    %cst_259 = arith.constant 9.99999996E-13 : f32
    %400 = vector.broadcast %cst_259 : f32 to vector<16x1xf32>
    %401 = arith.addf %397, %400 : vector<16x1xf32>
    %402 = math.rsqrt %401 : vector<16x1xf32>
    %403 = vector.broadcast %402 : vector<16x1xf32> to vector<16x64xf32>
    %404 = arith.mulf %399, %403 : vector<16x64xf32>
    %405 = vector.broadcast %384 : vector<1x64xf32> to vector<16x64xf32>
    %406 = arith.mulf %404, %405 : vector<16x64xf32>
    %407 = vector.broadcast %386 : vector<1x64xf32> to vector<16x64xf32>
    %408 = arith.addf %406, %407 : vector<16x64xf32>
    %409 = vector.extract_strided_slice %408 {offsets = [0, 0], sizes = [1, 64], strides = [1, 1]} : vector<16x64xf32> to vector<1x64xf32>
    %410 = vector.extract_strided_slice %408 {offsets = [8, 0], sizes = [1, 64], strides = [1, 1]} : vector<16x64xf32> to vector<1x64xf32>
    %411 = tpu.concatenate %409, %410 in 0 : vector<1x64xf32>, vector<1x64xf32> -> vector<2x64xf32>
    %412 = arith.truncf %411 : vector<2x64xf32> to vector<2x64xbf16>
    %c0_260 = arith.constant 0 : index
    %c0_261 = arith.constant 0 : index
    %413 = vector.load %arg25[%c0_260, %c0_261] : memref<64x64xbf16, #tpu.memory_space<vmem>>, vector<64x64xbf16>
    %cst_262 = arith.constant dense<0.000000e+00> : vector<2x64xf32>
    %414 = tpu.matmul %412, %413, %cst_262 {dimension_numbers = #tpu.dot_dimension_numbers<[1], [0], [0], [1], [0, 0, 1, 1], [], []>} : vector<2x64xbf16>, vector<64x64xbf16>, vector<2x64xf32> -> vector<2x64xf32>
    %c0_263 = arith.constant 0 : index
    %c0_264 = arith.constant 0 : index
    %415 = vector.load %arg26[%c0_263, %c0_264] : memref<1x64xf32, #tpu.memory_space<vmem>>, vector<1x64xf32>
    %416 = vector.broadcast %415 : vector<1x64xf32> to vector<2x64xf32>
    %417 = arith.addf %414, %416 : vector<2x64xf32>
    %418 = math.tanh %417 : vector<2x64xf32>
    %419 = arith.truncf %418 : vector<2x64xf32> to vector<2x64xbf16>
    %c0_265 = arith.constant 0 : index
    %c0_266 = arith.constant 0 : index
    %420 = vector.load %arg27[%c0_265, %c0_266] : memref<64x2xbf16, #tpu.memory_space<vmem>>, vector<64x2xbf16>
    %cst_267 = arith.constant dense<0.000000e+00> : vector<2x2xf32>
    %421 = tpu.matmul %419, %420, %cst_267 {dimension_numbers = #tpu.dot_dimension_numbers<[1], [0], [0], [1], [0, 0, 1, 1], [], []>} : vector<2x64xbf16>, vector<64x2xbf16>, vector<2x2xf32> -> vector<2x2xf32>
    %c0_268 = arith.constant 0 : index
    %c0_269 = arith.constant 0 : index
    %422 = vector.load %arg28[%c0_268, %c0_269] : memref<1x2xf32, #tpu.memory_space<vmem>>, vector<1x2xf32>
    %423 = vector.broadcast %422 : vector<1x2xf32> to vector<2x2xf32>
    %424 = arith.addf %421, %423 : vector<2x2xf32>
    %c0_270 = arith.constant 0 : index
    %c0_271 = arith.constant 0 : index
    %425 = vector.load %arg29[%c0_270, %c0_271] : memref<2x2xf32, #tpu.memory_space<vmem>>, vector<2x2xf32>
    tpu.vector_store %arg29[%c0_270, %c0_271], %424 {strides = array<i32>} : memref<2x2xf32, #tpu.memory_space<vmem>>, vector<2x2xf32>,
    return
  }
}

</mosaic_0001>

<bundles_post_ra>
// kernel: net_forward.1
= control target key start
LH: loop header
LB: loop body
LE: loop exit
PB: predicated region body
PF: predicated region fallthrough
CT: control target
= control target key end

     0   :  { %s3831_s6 = smov 1   ;;  %s3832_s10 = smov 2   ;;  %s4493_s0 = inlined_call_operand.smem [shape: u32[30], index: -1, kind: input, shape index: {}] }
   0x1   :  { %s3872_s5 = sld [smem:[%s4493_s0]]   ;;  %s3833_s14 = smov 3  }
   0x2   :  { %s3877_s9 = sld [smem:[%s4493_s0 + %s3831_s6]]   ;;  %s3834_s18 = smov 4  }
   0x3   :  { %s3882_s13 = sld [smem:[%s4493_s0 + %s3832_s10]]   ;;  %s3835_s22 = smov 5  }
   0x4   :  { %s3887_s17 = sld [smem:[%s4493_s0 + %s3833_s14]]   ;;  %s3836_s26 = smov 6  }
   0x5   :  { %s3892_s21 = sld [smem:[%s4493_s0 + %s3834_s18]]   ;;  %s3837_s30 = smov 7  }
   0x6   :  { %s3897_s25 = sld [smem:[%s4493_s0 + %s3835_s22]]   ;;  %s3838_s4 = smov 8  }
   0x7   :  { %s2863_s29 = sld [smem:[%s4493_s0 + %s3836_s26]]   ;;  %s3839_s10 = smov 9  }
   0x8   :  { %s3905_s3 = sld [smem:[%s4493_s0 + %s3837_s30]]   ;;  %s3840_s15 = smov 10  }
   0x9   :  { %s3910_s8 = sld [smem:[%s4493_s0 + %s3838_s4]]   ;;  %s3841_s20 = smov 11  }
   0xa   :  { %s3915_s14 = sld [smem:[%s4493_s0 + %s3839_s10]]   ;;  %s3842_s26 = smov 12  }
   0xb   :  { %s3920_s19 = sld [smem:[%s4493_s0 + %s3840_s15]]   ;;  %s3843_s1 = smov 13  }
   0xc   :  { %s3925_s24 = sld [smem:[%s4493_s0 + %s3841_s20]]   ;;  %s3844_s7 = smov 14  }
   0xd   :  { %s3930_s30 = sld [smem:[%s4493_s0 + %s3842_s26]]   ;;  %v64_v0 = vstv %s2863_s29  ;;  %s3845_s15 = smov 15  }
   0xe   :  { %s3935_s6 = sld [smem:[%s4493_s0 + %s3843_s1]]   ;;  %65 = vst [vmem:[#allocation2] sm:$0x1] %v64_v0  ;;  %s3846_s29 = smov 16  }
   0xf   :  { %s3940_s12 = sld [smem:[%s4493_s0 + %s3844_s7]]   ;;  %s3847_s27 = smov 17  }
  0x10   :  { %s3945_s20 = sld [smem:[%s4493_s0 + %s3845_s15]]   ;;  %s3848_s4 = smov 18  }
  0x11   :  { %s3950_s26 = sld [smem:[%s4493_s0 + %s3846_s29]]   ;;  %s3849_s15 = smov 19  }
  0x12   :  { %s3955_s2 = sld [smem:[%s4493_s0 + %s3847_s27]]   ;;  %s3850_s29 = smov 20  }
  0x13   :  { %s3960_s11 = sld [smem:[%s4493_s0 + %s3848_s4]]   ;;  %s3851_s27 = smov 21  }
  0x14   :  { %s3852_s4 = smov 22  }
  0x16   :  { %4505 = sst [smem:[#allocation6_spill]] %s3945_s20 }
  0x17   :  { %4506 = sst [smem:[#allocation7_spill]] %s3950_s26 }
  0x18   :  { %4507 = sst [smem:[#allocation8_spill]] %s3955_s2 }
  0x19   :  { %4508 = sst [smem:[#allocation9_spill]] %s3960_s11 }
  0x1a   :  { %s3965_s20 = sld [smem:[%s4493_s0 + %s3849_s15]]   ;;  %s3853_s15 = smov 23  }
  0x1b   :  { %s3970_s26 = sld [smem:[%s4493_s0 + %s3850_s29]]   ;;  %s3854_s29 = smov 24  }
  0x1c   :  { %s3975_s2 = sld [smem:[%s4493_s0 + %s3851_s27]]   ;;  %s3855_s27 = smov 25  }
  0x1d   :  { %s3980_s11 = sld [smem:[%s4493_s0 + %s3852_s4]]   ;;  %s3856_s4 = smov 26  }
  0x20   :  { %4509 = sst [smem:[#allocation10_spill]] %s3965_s20 }
  0x21   :  { %4510 = sst [smem:[#allocation11_spill]] %s3970_s26 }
  0x22   :  { %4511 = sst [smem:[#allocation12_spill]] %s3975_s2 }
  0x23   :  { %4512 = sst [smem:[#allocation13_spill]] %s3980_s11 }
  0x24   :  { %s3985_s20 = sld [smem:[%s4493_s0 + %s3853_s15]]   ;;  %s3857_s15 = smov 27  }
  0x25   :  { %s3990_s26 = sld [smem:[%s4493_s0 + %s3854_s29]]   ;;  %s3858_s29 = smov 28  }
  0x26   :  { %s3995_s2 = sld [smem:[%s4493_s0 + %s3855_s27]]   ;;  %s3859_s27 = smov 29  }
  0x27   :  { %s4000_s11 = sld [smem:[%s4493_s0 + %s3856_s4]]  }
  0x2a   :  { %4513 = sst [smem:[#allocation14_spill]] %s3985_s20 }
  0x2b   :  { %4514 = sst [smem:[#allocation15_spill]] %s3990_s26 }
  0x2c   :  { %4515 = sst [smem:[#allocation16_spill]] %s3995_s2 }
  0x2d   :  { %s4005_s20 = sld [smem:[%s4493_s0 + %s3857_s15]]  }
  0x2e   :  { %s4010_s26 = sld [smem:[%s4493_s0 + %s3858_s29]]  }
  0x2f   :  { %s4015_s2 = sld [smem:[%s4493_s0 + %s3859_s27]]  }
  0x30   :  { %v126_v1 = vld [vmem:[%s3872_s5] sm:$0xff]  ;;  %vm130_vm0 = vcmask 523264   ;;  %v127_v2 = vld [vmem:[%s3872_s5 + $0x8] sm:$0xff] }
  0x31   :  { %v131_v3 = vsel %vm130_vm0, %v126_v1, 0.0  ;;  %v134_v4 = vsel %vm130_vm0, %v127_v2, 0.0 }
  0x32   :  { %132 = vadd.xlane.f32.xlu0 %v131_v3 }
  0x36   :  { %135 = vadd.xlane.f32.xlu0 %v134_v4 }
  0x37   :  { %66 = vsyncpa [#allocation4], 0  ;;  %v3647_v15 = vld [vmem:[%s3905_s3] sm:$0xff]   ;;  %v3860_v16 = vmov 0.0   ;;  %vm3861_vm1 = vmmov 0   ;;  %v3648_v17 = vld [vmem:[%s3905_s3 + $0x8] sm:$0xff]  }
  0x38   :  { %3292 = vmatprep.subr.bf16.mxu0 %v3860_v16  ;;  %3296 = vmatprep.mubr.msk.bf16.mxu0 %vm3861_vm1, %v3860_v16  ;;  %v210_v18 = vld [vmem:[%s3877_s9] sm:$0xff]  ;;  %v211_v19 = vld [vmem:[%s3877_s9 + $0x8] sm:$0xff]  ;;  %vm236_vm2 = vcmask 261120   ;;  %v3862_v42 = vmov 0   ;;  %v3653_v4 = vld [vmem:[%s3915_s14 + $0x10] sm:$0xff]   ;;  %vm608_vm3 = vcmask 130048  }
  0x39   :  { %3293 = vmatpush3.bf16.msra.mxu0 %v3647_v15  ;;  %3300 = vmatprep.subr.bf16.mxu1 %v3860_v16  ;;  %v212_v20 = vpack.c.bf16 %v211_v19, %v210_v18  ;;  %v2887_v28 = vld [vmem:[%s3887_s17] ss:$0 sm:$0xff]  ;;  %v3651_v62 = vld [vmem:[%s3915_s14 + $0x8] sm:$0xff]   ;;  %s4516_s0 = sld [smem:[#allocation6_spill]]  ;;  %s4517_s5 = sld [smem:[#allocation7_spill]]  ;;  %vm2673_vm4 = vcmask 1040384  }
  0x3a   :  { %3294 = vmatprep.subr.bf16.mxu0 %v3860_v16  ;;  %3308 = vmatprep.mubr.msk.bf16.mxu1 %vm3861_vm1, %v3860_v16  ;;  %v2888_v30 = vld [vmem:[%s3892_s21] ss:$0 sm:$0xff]  ;;  %v3652_v0 = vld [vmem:[%s3925_s24 + $0x8] sm:$0xff]   ;;  %s4518_s9 = sld [smem:[#allocation10_spill]]  ;;  %s4520_s17 = sld [smem:[#allocation9_spill]]  ;;  %vm2842_vm5 = vcmask 9216  }
  0x3b   :  { %v2889_v33 = vld [vmem:[%s3897_s25] ss:$0 sm:$0xff]  ;;  %3646 = vset.pattern.permute.xlu1 %v3862_v42  ;;  %3645 = vset.pattern.permute.xlu0 %v3862_v42  ;;  %s4521_s21 = sld [smem:[#allocation12_spill]]  ;;  %s4522_s25 = sld [smem:[#allocation11_spill]] }
  0x3c   :  { %v2890_v45 = vld [vmem:[#allocation2] ss:$0 sm:$0xff]  ;;  %s4523_s3 = sld [smem:[#allocation13_spill]]  ;;  %s4525_s4 = sld [smem:[#allocation15_spill]] }
  0x3d   :  { %3295 = vmatpush3.bf16.msra.mxu0 %v3648_v17  ;;  %v3649_v58 = vld [vmem:[%s3915_s14] sm:$0xff]  }
  0x3e   :  { %3312 = vmatprep.subr.bf16.mxu0 %v3860_v16  ;;  %v3650_v60 = vld [vmem:[%s3925_s24] sm:$0xff]   ;;  %3301 = vmatpush3.bf16.msra.mxu1 %v3649_v58 }
  0x3f   :  { %3302 = vmatprep.subr.bf16.mxu1 %v3860_v16 }
  0x40   :  { %3297 = vmatmul.mubr.msk.bf16.vlgmr.msra.gmra.mrb[0].mxu0 %vm236_vm2, %v212_v20 }
  0x41   :  { %3320 = vmatprep.mubr.msk.bf16.mxu0 %vm3861_vm1, %v3860_v16  ;;  %3313 = vmatpush3.bf16.msra.mxu0 %v3650_v60  ;;  %v2924_v60 = vld [vmem:[%s3920_s19 + $0x1] ss:$0 sm:$0xff] }
  0x42   :  { %3314 = vmatprep.subr.bf16.mxu0 %v3860_v16  ;;  %3303 = vmatpush3.bf16.msra.mxu1 %v3651_v62 }
  0x43   :  { %3304 = vmatprep.subr.bf16.mxu1 %v3860_v16 }
  0x45   :  { %3315 = vmatpush3.bf16.msra.mxu0 %v3652_v0 }
  0x46   :  { %3316 = vmatprep.subr.bf16.mxu0 %v3860_v16  ;;  %3305 = vmatpush3.bf16.msra.mxu1 %v3653_v4  ;;  %v2954_v4 = vld [vmem:[%s3940_s12 + $0x1] ss:$0 sm:$0xff] }
  0x47   :  { %3306 = vmatprep.subr.bf16.mxu1 %v3860_v16 }
  0xbf   :  { %v133_v5 = vpop.xlane.xlu0 %132 }
  0xc0   :  { %v138_v6 = vmul.f32 0.015625, %v133_v5  ;;  %v3654_v5 = vld [vmem:[%s3925_s24 + $0x10] sm:$0xff]  }
  0xc1   :  { %3317 = vmatpush3.bf16.msra.mxu0 %v3654_v5 }
  0xc2   :  { %v140_v7 = vsub.f32 %v126_v1, %v138_v6  ;;  %v3655_v6 = vld [vmem:[%s3915_s14 + $0x18] sm:$0xff]   ;;  %3318 = vmatprep.subr.bf16.mxu0 %v3860_v16 }
  0xc3   :  { %v136_v8 = vpop.xlane.xlu0 %135  ;;  %3307 = vmatpush3.bf16.msra.mxu1 %v3655_v6 }
  0xc4   :  { %v139_v9 = vmul.f32 0.015625, %v136_v8  ;;  %v142_v10 = vmul.f32 %v140_v7, %v140_v7  ;;  %3324 = vmatprep.subr.bf16.mxu1 %v3860_v16 }
  0xc6   :  { %v141_v11 = vsub.f32 %v127_v2, %v139_v9  ;;  %v144_v12 = vsel %vm130_vm0, %v142_v10, 0.0  ;;  %v2891_v9 = vld [vmem:[%s3910_s8] ss:$0 sm:$0xff]  ;;  %s4524_s8 = sld [smem:[#allocation14_spill]] }
  0xc7   :  { %145 = vadd.xlane.f32.xlu1 %v144_v12 }
  0xc8   :  { %v143_v13 = vmul.f32 %v141_v11, %v141_v11 }
  0xca   :  { %v147_v14 = vsel %vm130_vm0, %v143_v13, 0.0 }
  0xcb   :  { %148 = vadd.xlane.f32.xlu1 %v147_v14 }
 0x113   :  { %v274_v43 = vpop.f32.mrb[0].mxu0 }
 0x114   :  { %v3298_v44 = vpop.f32.mrb[1].mxu0  ;;  %v275_v12 = vadd.f32 %v2891_v9, %v274_v43 }
 0x115   :  { %v277_v2 = vpop.f32.mrb[2].mxu0 }
 0x116   :  { %v3299_v3 = vpop.f32.mrb[3].mxu0  ;;  %v278_v14 = vadd.f32 %v2891_v9, %v277_v2 }
 0x154   :  { %v146_v21 = vpop.xlane.xlu1 %145 }
 0x155   :  { %v150_v22 = vmul.f32 0.015625, %v146_v21 }
 0x157   :  { %v152_v23 = vadd.f32 1e-12, %v150_v22  ;;  %v3657_v22 = vld [vmem:[%s3935_s6] sm:$0xff]  }
 0x158   :  { %v149_v24 = vpop.xlane.xlu1 %148 }
 0x159   :  { %3737 = vrsqrt.f32 %v152_v23  ;;  %v151_v25 = vmul.f32 0.015625, %v149_v24  ;;  %v3658_v24 = vld [vmem:[%s3935_s6 + $0x8] sm:$0xff]  }
 0x15b   :  { %v153_v26 = vadd.f32 1e-12, %v151_v25  ;;  %v3659_v25 = vld [vmem:[%s3935_s6 + $0x10] sm:$0xff]  }
 0x15d   :  { %3739 = vrsqrt.f32 %v153_v26  ;;  %v3660_v26 = vld [vmem:[%s3935_s6 + $0x18] sm:$0xff]  }
 0x163   :  { %v3738_v27 = vpop.eup %3737 }
 0x164   :  { %v156_v29 = vmul.f32 %v3738_v27, %v140_v7  ;;  %v3656_v7 = vld [vmem:[%s3925_s24 + $0x18] sm:$0xff]   ;;  %v3661_v27 = vld [vmem:[%s3915_s14 + $0x20] sm:$0xff]  }
 0x165   :  { %3319 = vmatpush3.bf16.msra.mxu0 %v3656_v7 }
 0x166   :  { %v164_v31 = vmul.f32 %v2887_v28, %v156_v29  ;;  %3336 = vmatprep.subr.bf16.mxu0 %v3860_v16  ;;  %v3663_v29 = vld [vmem:[%s3915_s14 + $0x30] sm:$0xff]  }
 0x167   :  { %v3740_v32 = vpop.eup %3739 }
 0x168   :  { %v4041_v34 = vadd.f32 %v2888_v30, %v164_v31  ;;  %v157_v35 = vmul.f32 %v3740_v32, %v141_v11  ;;  %v3665_v31 = vld [vmem:[%s3935_s6 + $0x20] sm:$0xff]   ;;  %v3666_v32 = vld [vmem:[%s3935_s6 + $0x28] sm:$0xff]  }
 0x16a   :  { %v181_v36 = vmul.f32 %v2889_v33, %v4041_v34  ;;  %v165_v37 = vmul.f32 %v2887_v28, %v157_v35  ;;  %v3662_v28 = vld [vmem:[%s3915_s14 + $0x28] sm:$0xff]   ;;  %v2895_v35 = vld [vmem:[%s3920_s19] ss:$0 sm:$0xff] }
 0x16c   :  { %v183_v38 = vsel %vm130_vm0, %v181_v36, 0.0  ;;  %v4045_v39 = vadd.f32 %v2888_v30, %v165_v37  ;;  %v3664_v30 = vld [vmem:[%s3915_s14 + $0x38] sm:$0xff]   ;;  %v2901_v37 = vld [vmem:[%s3930_s30] ss:$0 sm:$0xff] }
 0x16d   :  { %184 = vadd.xlane.f32.xlu0 %v183_v38 }
 0x16e   :  { %v182_v40 = vmul.f32 %v2889_v33, %v4045_v39  ;;  %v3667_v33 = vld [vmem:[%s3935_s6 + $0x30] sm:$0xff]  }
 0x170   :  { %v186_v41 = vsel %vm130_vm0, %v182_v40, 0.0 }
 0x171   :  { %187 = vadd.xlane.f32.xlu1 %v186_v41 }
 0x1fa   :  { %v185_v46 = vpop.xlane.xlu0 %184 }
 0x1fb   :  { %v196_v47 = vadd.f32 %v2890_v45, %v185_v46 }
 0x1fd   :  { %v198_v48 = vsub.f32 0.0, %v196_v47 }
 0x1fe   :  { %v188_v49 = vpop.xlane.xlu1 %187 }
 0x1ff   :  { %v200_v50 = vmul.f32 1.442695, %v198_v48  ;;  %v197_v51 = vadd.f32 %v2890_v45, %v188_v49 }
 0x201   :  { %3741 = vpow2.f32 %v200_v50  ;;  %v199_v52 = vsub.f32 0.0, %v197_v51 }
 0x203   :  { %v202_v53 = vmul.f32 1.442695, %v199_v52  ;;  %v2907_v52 = vld [vmem:[%s3940_s12] ss:$0 sm:$0xff] }
 0x205   :  { %3743 = vpow2.f32 %v202_v53 }
 0x20b   :  { %v3742_v54 = vpop.eup %3741 }
 0x20c   :  { %v204_v55 = vadd.f32 1.0, %v3742_v54 }
 0x20e   :  { %3745 = vrcp.f32 %v204_v55 }
 0x20f   :  { %v3744_v56 = vpop.eup %3743 }
 0x210   :  { %v205_v57 = vadd.f32 1.0, %v3744_v56 }
 0x212   :  { %3747 = vrcp.f32 %v205_v57 }
 0x218   :  { %v3746_v59 = vpop.eup %3745 }
 0x219   :  { %297 = vperm.xlu1 %3646, %v3746_v59   ;;  %v281_v61 = vsub.f32 1.0, %v3746_v59 }
 0x21b   :  { %285 = vperm.xlu0 %3645, %v281_v61  }
 0x21c   :  { %v3748_v63 = vpop.eup %3747 }
 0x21d   :  { %v282_v1 = vsub.f32 1.0, %v3748_v63 }
 0x21f   :  { %290 = vperm.xlu1 %3646, %v282_v1  }
 0x223   :  { %302 = vperm.xlu1 %3646, %v3748_v63  }
 0x298   :  { %v298_v8 = vpop.permute.xlu1 %297 }
 0x299   :  { %v305_v17 = vmul.f32 %v298_v8, %v275_v12 }
 0x29a   :  { %v286_v10 = vpop.permute.xlu0 %285 }
 0x29b   :  { %v293_v13 = vmul.f32 %v286_v10, %v4041_v34  ;;  %v3668_v34 = vld [vmem:[%s3935_s6 + $0x38] sm:$0xff]  }
 0x29d   :  { %v4068_v20 = vadd.f32 %v305_v17, %v293_v13  ;;  %v4144_v13 = vld [vmem:[%s3882_s13] sm:$0xff] }
 0x29e   :  { %v291_v11 = vpop.permute.xlu1 %290 }
 0x29f   :  { %v294_v18 = vmul.f32 %v291_v11, %v4045_v39 }
 0x2a2   :  { %v303_v15 = vpop.permute.xlu1 %302 }
 0x2a3   :  { %v306_v19 = vmul.f32 %v303_v15, %v278_v14 }
 0x2a5   :  { %v4070_v21 = vadd.f32 %v306_v19, %v294_v18  ;;  %v4147_v18 = vld [vmem:[%s3882_s13 + $0x8] sm:$0xff]  ;;  %s4519_s13 = sld [smem:[#allocation8_spill]] }
 0x2a7   :  { %v4075_v23 = vpack.c.bf16 %v4070_v21, %v4068_v20 }
 0x2a9   :  { %3309 = vmatmul.mubr.msk.bf16.vlgmr.msra.gmra.mrb[0].mxu1 %vm130_vm0, %v4075_v23  ;;  %3321 = vmatmul.mubr.msk.bf16.vlgmr.msra.gmra.mrb[4].mxu0 %vm130_vm0, %v4075_v23 }
 0x2aa   :  { %3325 = vmatpush3.bf16.msra.mxu1 %v3657_v22  ;;  %3332 = vmatprep.mubr.msk.bf16.mxu1 %vm3861_vm1, %v3860_v16 }
 0x2ab   :  { %3326 = vmatprep.subr.bf16.mxu1 %v3860_v16  ;;  %3338 = vmatprep.mubr.msk.bf16.mxu0 %vm3861_vm1, %v3860_v16 }
 0x2ae   :  { %3327 = vmatpush3.bf16.msra.mxu1 %v3658_v24 }
 0x2af   :  { %3328 = vmatprep.subr.bf16.mxu1 %v3860_v16 }
 0x2b2   :  { %3329 = vmatpush3.bf16.msra.mxu1 %v3659_v25 }
 0x2b3   :  { %3330 = vmatprep.subr.bf16.mxu1 %v3860_v16 }
 0x2b6   :  { %3331 = vmatpush3.bf16.msra.mxu1 %v3660_v26 }
 0x2b7   :  { %3348 = vmatprep.subr.bf16.mxu1 %v3860_v16 }
 0x2b9   :  { %3333 = vmatmul.mubr.msk.bf16.vlgmr.msra.gmra.mrb[4].mxu1 %vm130_vm0, %v4075_v23 }
 0x2ba   :  { %3349 = vmatpush3.bf16.msra.mxu1 %v3661_v27  ;;  %3356 = vmatprep.mubr.msk.bf16.mxu1 %vm3861_vm1, %v3860_v16 }
 0x2bb   :  { %3350 = vmatprep.subr.bf16.mxu1 %v3860_v16 }
 0x2be   :  { %3351 = vmatpush3.bf16.msra.mxu1 %v3662_v28 }
 0x2bf   :  { %3352 = vmatprep.subr.bf16.mxu1 %v3860_v16 }
 0x2c2   :  { %3353 = vmatpush3.bf16.msra.mxu1 %v3663_v29 }
 0x2c3   :  { %3354 = vmatprep.subr.bf16.mxu1 %v3860_v16 }
 0x2c6   :  { %3355 = vmatpush3.bf16.msra.mxu1 %v3664_v30 }
 0x2c7   :  { %3372 = vmatprep.subr.bf16.mxu1 %v3860_v16 }
 0x2c9   :  { %3357 = vmatmul.mubr.msk.bf16.vlgmr.msra.gmra.mrb[8].mxu1 %vm130_vm0, %v4075_v23 }
 0x2ca   :  { %3373 = vmatpush3.bf16.msra.mxu1 %v3665_v31  ;;  %3380 = vmatprep.mubr.msk.bf16.mxu1 %vm3861_vm1, %v3860_v16 }
 0x2cb   :  { %3374 = vmatprep.subr.bf16.mxu1 %v3860_v16 }
 0x2ce   :  { %3375 = vmatpush3.bf16.msra.mxu1 %v3666_v32 }
 0x2cf   :  { %3376 = vmatprep.subr.bf16.mxu1 %v3860_v16 }
 0x2d2   :  { %3377 = vmatpush3.bf16.msra.mxu1 %v3667_v33 }
 0x2d3   :  { %3378 = vmatprep.subr.bf16.mxu1 %v3860_v16 }
 0x2d6   :  { %3379 = vmatpush3.bf16.msra.mxu1 %v3668_v34 }
 0x2d7   :  { %3396 = vmatprep.subr.bf16.mxu1 %v3860_v16 }
 0x2d9   :  { %3381 = vmatmul.mubr.msk.bf16.vlgmr.msra.gmra.mrb[12].mxu1 %vm130_vm0, %v4075_v23 }
 0x2da   :  { %3400 = vmatprep.mubr.msk.bf16.mxu1 %vm3861_vm1, %v3860_v16 }
 0x37c   :  { %v388_v36 = vpop.f32.mrb[0].mxu1  ;;  %v468_v38 = vpop.f32.mrb[4].mxu0 }
 0x37d   :  { %v3310_v39 = vpop.f32.mrb[1].mxu1  ;;  %v3322_v40 = vpop.f32.mrb[5].mxu0  ;;  %v389_v43 = vadd.f32 %v2895_v35, %v388_v36  ;;  %v469_v44 = vadd.f32 %v2901_v37, %v468_v38 }
 0x37e   :  { %v391_v41 = vpop.f32.mrb[2].mxu1  ;;  %v471_v42 = vpop.f32.mrb[6].mxu0 }
 0x37f   :  { %v392_v45 = vadd.f32 %v2895_v35, %v391_v41  ;;  %v472_v46 = vadd.f32 %v2901_v37, %v471_v42  ;;  %v3311_v47 = vpop.f32.mrb[3].mxu1  ;;  %v3323_v48 = vpop.f32.mrb[7].mxu0 }
 0x380   :  { %v3671_v47 = vld [vmem:[%s3925_s24 + $0x30] sm:$0xff]   ;;  %v3672_v48 = vld [vmem:[%s3925_s24 + $0x38] sm:$0xff]  }
 0x381   :  { %v555_v49 = vpack.c.bf16 %v392_v45, %v389_v43  ;;  %v556_v50 = vpack.c.bf16 %v472_v46, %v469_v44  ;;  %v3669_v44 = vld [vmem:[%s3925_s24 + $0x20] sm:$0xff]   ;;  %v3670_v46 = vld [vmem:[%s3925_s24 + $0x28] sm:$0xff]  }
 0x383   :  { %v561_v51 = vsel %vm236_vm2, %v556_v50, 0 }
 0x384   :  { %3337 = vmatpush3.bf16.xpose.msra.mxu0 %v561_v51 }
 0x385   :  { %3342 = vmatprep.subr.bf16.mxu0 %v3860_v16 }
 0x38b   :  { %3339 = vmatmul.mubr.msk.bf16.vlgmr.msra.gmra.mrb[8].mxu0 %vm236_vm2, %v555_v49 }
 0x38c   :  { %v548_v53 = vpop.f32.mrb[4].mxu1  ;;  %3344 = vmatprep.mubr.msk.bf16.mxu0 %vm3861_vm1, %v3860_v16 }
 0x38d   :  { %v3334_v54 = vpop.f32.mrb[5].mxu1  ;;  %v549_v56 = vadd.f32 %v2907_v52, %v548_v53 }
 0x38e   :  { %v551_v55 = vpop.f32.mrb[6].mxu1  ;;  %v2939_v54 = vld [vmem:[%s3930_s30 + $0x1] ss:$0 sm:$0xff] }
 0x38f   :  { %v552_v57 = vadd.f32 %v2907_v52, %v551_v55  ;;  %v3335_v58 = vpop.f32.mrb[7].mxu1 }
 0x391   :  { %v632_v59 = vpack.c.bf16 %v552_v57, %v549_v56 }
 0x393   :  { %3343 = vmatpush3.bf16.msra.mxu0 %v632_v59 }
 0x394   :  { %3360 = vmatprep.subr.bf16.mxu0 %v3860_v16 }
 0x39c   :  { %v757_v61 = vpop.f32.mrb[8].mxu1 }
 0x39d   :  { %v3358_v62 = vpop.f32.mrb[9].mxu1  ;;  %v4130_v0 = vadd.f32 %v2924_v60, %v757_v61 }
 0x39e   :  { %v760_v63 = vpop.f32.mrb[10].mxu1 }
 0x39f   :  { %v4132_v1 = vadd.f32 %v2924_v60, %v760_v63  ;;  %v3359_v2 = vpop.f32.mrb[11].mxu1 }
 0x3a1   :  { %v928_v3 = vpack.c.bf16 %v4132_v1, %v4130_v0 }
 0x3ac   :  { %v921_v5 = vpop.f32.mrb[12].mxu1 }
 0x3ad   :  { %v3382_v6 = vpop.f32.mrb[13].mxu1  ;;  %v4137_v8 = vadd.f32 %v2954_v4, %v921_v5 }
 0x3ae   :  { %v924_v7 = vpop.f32.mrb[14].mxu1 }
 0x3af   :  { %v4139_v9 = vadd.f32 %v2954_v4, %v924_v7  ;;  %v3383_v10 = vpop.f32.mrb[15].mxu1 }
 0x3b1   :  { %v1004_v11 = vpack.c.bf16 %v4139_v9, %v4137_v8 }
 0x45e   :  { %v597_v12 = vpop.f32.mrb[8].mxu0 }
 0x45f   :  { %v604_v14 = vmul.f32 0.17677669, %v597_v12  ;;  %v3340_v15 = vpop.f32.mrb[9].mxu0 }
 0x460   :  { %v600_v17 = vpop.f32.mrb[10].mxu0 }
 0x461   :  { %v605_v19 = vmul.f32 0.17677669, %v600_v17  ;;  %v3341_v22 = vpop.f32.mrb[11].mxu0  ;;  %v606_v24 = vadd.f32 %v604_v14, %v4144_v13 }
 0x463   :  { %v609_v25 = vsel %vm608_vm3, %v606_v24, -inf  ;;  %v607_v26 = vadd.f32 %v605_v19, %v4147_v18 }
 0x464   :  { %610 = vmax.xlane.f32.xlu1 %v609_v25 }
 0x465   :  { %v612_v27 = vsel %vm608_vm3, %v607_v26, -inf }
 0x466   :  { %613 = vmax.xlane.f32.xlu0 %v612_v27 }
 0x4f1   :  { %v611_v28 = vpop.xlane.xlu1 %610 }
 0x4f2   :  { %v615_v29 = vsub.f32 %v606_v24, %v611_v28  ;;  %v3675_v24 = vld [vmem:[%s4516_s0 + $0x10] sm:$0xff]  }
 0x4f3   :  { %v614_v30 = vpop.xlane.xlu0 %613  ;;  %3397 = vmatpush3.bf16.msra.mxu1 %v3675_v24 }
 0x4f4   :  { %v617_v31 = vmul.f32 1.442695, %v615_v29  ;;  %v616_v32 = vsub.f32 %v607_v26, %v614_v30  ;;  %3398 = vmatprep.subr.bf16.mxu1 %v3860_v16 }
 0x4f6   :  { %3749 = vpow2.f32 %v617_v31  ;;  %v619_v33 = vmul.f32 1.442695, %v616_v32  ;;  %v3673_v31 = vld [vmem:[%s4516_s0] sm:$0xff]  }
 0x4f8   :  { %3751 = vpow2.f32 %v619_v33  ;;  %v3674_v33 = vld [vmem:[%s4516_s0 + $0x8] sm:$0xff]  }
 0x500   :  { %v3750_v34 = vpop.eup %3749 }
 0x501   :  { %v621_v35 = vsel %vm608_vm3, %v3750_v34, 0.0 }
 0x502   :  { %v3752_v36 = vpop.eup %3751  ;;  %622 = vadd.xlane.f32.xlu1 %v621_v35 }
 0x503   :  { %v624_v37 = vsel %vm608_vm3, %v3752_v36, 0.0 }
 0x506   :  { %625 = vadd.xlane.f32.xlu1 %v624_v37 }
 0x58f   :  { %v623_v38 = vpop.xlane.xlu1 %622 }
 0x590   :  { %3753 = vrcp.f32 %v623_v38 }
 0x593   :  { %v626_v39 = vpop.xlane.xlu1 %625 }
 0x594   :  { %3755 = vrcp.f32 %v626_v39 }
 0x59a   :  { %v3754_v40 = vpop.eup %3753 }
 0x59b   :  { %v629_v42 = vmul.f32 %v3754_v40, %v3750_v34  ;;  %v3676_v34 = vld [vmem:[%s4516_s0 + $0x18] sm:$0xff]  }
 0x59c   :  { %3399 = vmatpush3.bf16.msra.mxu1 %v3676_v34  ;;  %v3688_v34 = vld [vmem:[%s4521_s21 + $0x38] sm:$0xff]  }
 0x59d   :  { %3412 = vmatprep.subr.bf16.mxu1 %v3860_v16 }
 0x59e   :  { %v3756_v41 = vpop.eup %3755 }
 0x59f   :  { %v630_v43 = vmul.f32 %v3756_v41, %v3752_v36 }
 0x5a1   :  { %v631_v45 = vpack.c.bf16 %v630_v43, %v629_v42 }
 0x5a3   :  { %3345 = vmatmul.mubr.msk.bf16.vlgmr.msra.gmra.mrb[12].mxu0 %vm608_vm3, %v631_v45  ;;  %v2972_v45 = vld [vmem:[%s4517_s5] ss:$0 sm:$0xff] }
 0x5a4   :  { %3361 = vmatpush3.bf16.msra.mxu0 %v3669_v44  ;;  %3368 = vmatprep.mubr.msk.bf16.mxu0 %vm3861_vm1, %v3860_v16 }
 0x5a5   :  { %3362 = vmatprep.subr.bf16.mxu0 %v3860_v16 }
 0x5a8   :  { %3363 = vmatpush3.bf16.msra.mxu0 %v3670_v46 }
 0x5a9   :  { %3364 = vmatprep.subr.bf16.mxu0 %v3860_v16 }
 0x5ac   :  { %3365 = vmatpush3.bf16.msra.mxu0 %v3671_v47 }
 0x5ad   :  { %3366 = vmatprep.subr.bf16.mxu0 %v3860_v16 }
 0x5b0   :  { %3367 = vmatpush3.bf16.msra.mxu0 %v3672_v48 }
 0x5b1   :  { %3384 = vmatprep.subr.bf16.mxu0 %v3860_v16 }
 0x5b3   :  { %3369 = vmatmul.mubr.msk.bf16.vlgmr.msra.gmra.mrb[16].mxu0 %vm130_vm0, %v4075_v23 }
 0x5b4   :  { %3386 = vmatprep.mubr.msk.bf16.mxu0 %vm3861_vm1, %v3860_v16 }
 0x676   :  { %v4170_v49 = vpop.f32.mrb[12].mxu0 }
 0x677   :  { %v3346_v50 = vpop.f32.mrb[13].mxu0 }
 0x678   :  { %v4172_v51 = vpop.f32.mrb[14].mxu0 }
 0x679   :  { %v677_v52 = vpack.c.bf16 %v4172_v51, %v4170_v49  ;;  %v3347_v53 = vpop.f32.mrb[15].mxu0 }
 0x686   :  { %v839_v55 = vpop.f32.mrb[16].mxu0 }
 0x687   :  { %v3370_v56 = vpop.f32.mrb[17].mxu0  ;;  %v840_v58 = vadd.f32 %v2939_v54, %v839_v55 }
 0x688   :  { %v842_v57 = vpop.f32.mrb[18].mxu0 }
 0x689   :  { %v843_v59 = vadd.f32 %v2939_v54, %v842_v57  ;;  %v3371_v60 = vpop.f32.mrb[19].mxu0 }
 0x68b   :  { %v929_v23 = vpack.c.bf16 %v843_v59, %v840_v58 }
 0x68d   :  { %v934_v61 = vsel %vm236_vm2, %v929_v23, 0 }
 0x68e   :  { %3385 = vmatpush3.bf16.xpose.msra.mxu0 %v934_v61 }
 0x68f   :  { %3390 = vmatprep.subr.bf16.mxu0 %v3860_v16 }
 0x695   :  { %3387 = vmatmul.mubr.msk.bf16.vlgmr.msra.gmra.mrb[20].mxu0 %vm236_vm2, %v928_v3 }
 0x696   :  { %3391 = vmatpush3.bf16.msra.mxu0 %v1004_v11  ;;  %3392 = vmatprep.mubr.msk.bf16.mxu0 %vm3861_vm1, %v3860_v16 }
 0x697   :  { %3404 = vmatprep.subr.bf16.mxu0 %v3860_v16 }
 0x768   :  { %v970_v62 = vpop.f32.mrb[20].mxu0 }
 0x769   :  { %v977_v63 = vmul.f32 0.17677669, %v970_v62  ;;  %v3388_v2 = vpop.f32.mrb[21].mxu0 }
 0x76a   :  { %v973_v4 = vpop.f32.mrb[22].mxu0  ;;  %v3677_v2 = vld [vmem:[%s4518_s9] sm:$0xff]  }
 0x76b   :  { %v978_v5 = vmul.f32 0.17677669, %v973_v4  ;;  %v3389_v6 = vpop.f32.mrb[23].mxu0  ;;  %v979_v7 = vadd.f32 %v977_v63, %v4144_v13  ;;  %v3678_v4 = vld [vmem:[%s4518_s9 + $0x8] sm:$0xff]  }
 0x76c   :  { %v3680_v6 = vld [vmem:[%s4518_s9 + $0x18] sm:$0xff]  }
 0x76d   :  { %v981_v0 = vsel %vm608_vm3, %v979_v7, -inf  ;;  %v980_v1 = vadd.f32 %v978_v5, %v4147_v18  ;;  %v3679_v5 = vld [vmem:[%s4518_s9 + $0x10] sm:$0xff]  }
 0x76e   :  { %982 = vmax.xlane.f32.xlu1 %v981_v0 }
 0x76f   :  { %v984_v3 = vsel %vm608_vm3, %v980_v1, -inf }
 0x772   :  { %985 = vmax.xlane.f32.xlu1 %v984_v3 }
 0x7fb   :  { %v983_v8 = vpop.xlane.xlu1 %982 }
 0x7fc   :  { %v987_v9 = vsub.f32 %v979_v7, %v983_v8 }
 0x7fe   :  { %v989_v10 = vmul.f32 1.442695, %v987_v9 }
 0x7ff   :  { %v986_v11 = vpop.xlane.xlu1 %985 }
 0x800   :  { %3757 = vpow2.f32 %v989_v10  ;;  %v988_v12 = vsub.f32 %v980_v1, %v986_v11  ;;  %v2973_v11 = vld [vmem:[%s4519_s13] ss:$0 sm:$0xff] }
 0x802   :  { %v991_v14 = vmul.f32 1.442695, %v988_v12 }
 0x804   :  { %3759 = vpow2.f32 %v991_v14 }
 0x80a   :  { %v3758_v15 = vpop.eup %3757 }
 0x80b   :  { %v993_v17 = vsel %vm608_vm3, %v3758_v15, 0.0 }
 0x80c   :  { %994 = vadd.xlane.f32.xlu0 %v993_v17 }
 0x80e   :  { %v3760_v19 = vpop.eup %3759 }
 0x80f   :  { %v996_v22 = vsel %vm608_vm3, %v3760_v19, 0.0 }
 0x810   :  { %997 = vadd.xlane.f32.xlu1 %v996_v22 }
 0x899   :  { %v995_v25 = vpop.xlane.xlu0 %994 }
 0x89a   :  { %3761 = vrcp.f32 %v995_v25 }
 0x89d   :  { %v998_v26 = vpop.xlane.xlu1 %997 }
 0x89e   :  { %3763 = vrcp.f32 %v998_v26 }
 0x8a4   :  { %v3762_v27 = vpop.eup %3761 }
 0x8a5   :  { %v1001_v29 = vmul.f32 %v3762_v27, %v3758_v15  ;;  %v3681_v27 = vld [vmem:[%s4521_s21] sm:$0xff]  }
 0x8a8   :  { %v3764_v28 = vpop.eup %3763 }
 0x8a9   :  { %v1002_v30 = vmul.f32 %v3764_v28, %v3760_v19  ;;  %v2974_v19 = vld [vmem:[%s4520_s17] ss:$0 sm:$0xff]  ;;  %v3682_v28 = vld [vmem:[%s4521_s21 + $0x8] sm:$0xff]  }
 0x8ab   :  { %v1003_v32 = vpack.c.bf16 %v1002_v30, %v1001_v29  ;;  %v3683_v29 = vld [vmem:[%s4521_s21 + $0x10] sm:$0xff]   ;;  %v3684_v30 = vld [vmem:[%s4521_s21 + $0x18] sm:$0xff]  }
 0x8ad   :  { %3393 = vmatmul.mubr.msk.bf16.vlgmr.msra.gmra.mrb[24].mxu0 %vm608_vm3, %v1003_v32  ;;  %v3686_v32 = vld [vmem:[%s4521_s21 + $0x28] sm:$0xff]  }
 0x8ae   :  { %3405 = vmatpush3.bf16.msra.mxu0 %v3673_v31  ;;  %3408 = vmatprep.mubr.msk.bf16.mxu0 %vm3861_vm1, %v3860_v16  ;;  %v3685_v31 = vld [vmem:[%s4521_s21 + $0x20] sm:$0xff]  }
 0x8af   :  { %3406 = vmatprep.subr.bf16.mxu0 %v3860_v16 }
 0x8b2   :  { %3407 = vmatpush3.bf16.msra.mxu0 %v3674_v33  ;;  %v3687_v33 = vld [vmem:[%s4521_s21 + $0x30] sm:$0xff]  }
 0x8b3   :  { %3424 = vmatprep.subr.bf16.mxu0 %v3860_v16 }
 0x8b5   :  { %3409 = vmatmul.mubr.msk.bf16.vlgmr.msra.gmra.mrb[28].mxu0 %vm236_vm2, %v677_v52 }
 0x8b6   :  { %3440 = vmatprep.mubr.msk.bf16.mxu0 %vm3861_vm1, %v3860_v16  ;;  %3425 = vmatpush3.bf16.msra.mxu0 %v3681_v27  ;;  %v3695_v27 = vld [vmem:[%s3915_s14 + $0x58] sm:$0xff]  }
 0x8b7   :  { %3426 = vmatprep.subr.bf16.mxu0 %v3860_v16 }
 0x8ba   :  { %3427 = vmatpush3.bf16.msra.mxu0 %v3682_v28  ;;  %v3696_v28 = vld [vmem:[%s3935_s6 + $0x58] sm:$0xff]  }
 0x8bb   :  { %3428 = vmatprep.subr.bf16.mxu0 %v3860_v16 }
 0x8be   :  { %3429 = vmatpush3.bf16.msra.mxu0 %v3683_v29 }
 0x8bf   :  { %3430 = vmatprep.subr.bf16.mxu0 %v3860_v16 }
 0x8c2   :  { %3431 = vmatpush3.bf16.msra.mxu0 %v3684_v30 }
 0x8c3   :  { %3432 = vmatprep.subr.bf16.mxu0 %v3860_v16 }
 0x8c6   :  { %3433 = vmatpush3.bf16.msra.mxu0 %v3685_v31 }
 0x8c7   :  { %3434 = vmatprep.subr.bf16.mxu0 %v3860_v16 }
 0x8ca   :  { %3435 = vmatpush3.bf16.msra.mxu0 %v3686_v32 }
 0x8cb   :  { %3436 = vmatprep.subr.bf16.mxu0 %v3860_v16 }
 0x8ce   :  { %3437 = vmatpush3.bf16.msra.mxu0 %v3687_v33 }
 0x8cf   :  { %3438 = vmatprep.subr.bf16.mxu0 %v3860_v16 }
 0x8d2   :  { %3439 = vmatpush3.bf16.msra.mxu0 %v3688_v34 }
 0x8d3   :  { %3468 = vmatprep.subr.bf16.mxu0 %v3860_v16 }
 0x980   :  { %v1042_v35 = vpop.f32.mrb[24].mxu0 }
 0x981   :  { %v3394_v36 = vpop.f32.mrb[25].mxu0 }
 0x982   :  { %v1045_v37 = vpop.f32.mrb[26].mxu0 }
 0x983   :  { %v1049_v38 = vpack.c.bf16 %v1045_v37, %v1042_v35  ;;  %v3395_v39 = vpop.f32.mrb[27].mxu0  ;;  %v2975_v35 = vld [vmem:[%s4522_s25] ss:$0 sm:$0xff] }
 0x985   :  { %3401 = vmatmul.mubr.msk.bf16.vlgmr.msra.gmra.mrb[16].mxu1 %vm236_vm2, %v1049_v38 }
 0x986   :  { %3420 = vmatprep.mubr.msk.bf16.mxu1 %vm3861_vm1, %v3860_v16  ;;  %3413 = vmatpush3.bf16.msra.mxu1 %v3677_v2 }
 0x987   :  { %3414 = vmatprep.subr.bf16.mxu1 %v3860_v16 }
 0x988   :  { %v1160_v40 = vpop.f32.mrb[28].mxu0 }
 0x989   :  { %v3410_v41 = vpop.f32.mrb[29].mxu0 }
 0x98a   :  { %v1163_v42 = vpop.f32.mrb[30].mxu0  ;;  %3415 = vmatpush3.bf16.msra.mxu1 %v3678_v4 }
 0x98b   :  { %v3411_v43 = vpop.f32.mrb[31].mxu0  ;;  %3416 = vmatprep.subr.bf16.mxu1 %v3860_v16 }
 0x98e   :  { %3417 = vmatpush3.bf16.msra.mxu1 %v3679_v5 }
 0x98f   :  { %3418 = vmatprep.subr.bf16.mxu1 %v3860_v16 }
 0x992   :  { %3419 = vmatpush3.bf16.msra.mxu1 %v3680_v6 }
 0x993   :  { %3444 = vmatprep.subr.bf16.mxu1 %v3860_v16 }
 0xa58   :  { %v1104_v44 = vpop.f32.mrb[16].mxu1 }
 0xa59   :  { %v1161_v46 = vadd.f32 %v1160_v40, %v1104_v44  ;;  %v3402_v47 = vpop.f32.mrb[17].mxu1 }
 0xa5a   :  { %v1107_v48 = vpop.f32.mrb[18].mxu1 }
 0xa5b   :  { %v1174_v49 = vadd.f32 %v2972_v45, %v1161_v46  ;;  %v1164_v50 = vadd.f32 %v1163_v42, %v1107_v48  ;;  %v3403_v51 = vpop.f32.mrb[19].mxu1 }
 0xa5d   :  { %v1175_v52 = vadd.f32 %v2972_v45, %v1164_v50  ;;  %v1176_v53 = vadd.f32 %v1174_v49, %v4068_v20 }
 0xa5f   :  { %v1180_v54 = vsel %vm130_vm0, %v1176_v53, 0.0  ;;  %v1177_v55 = vadd.f32 %v1175_v52, %v4070_v21 }
 0xa60   :  { %1181 = vadd.xlane.f32.xlu0 %v1180_v54 }
 0xa61   :  { %v1183_v56 = vsel %vm130_vm0, %v1177_v55, 0.0 }
 0xa62   :  { %1184 = vadd.xlane.f32.xlu1 %v1183_v56 }
 0xaed   :  { %v1182_v57 = vpop.xlane.xlu0 %1181 }
 0xaee   :  { %v1186_v58 = vmul.f32 0.015625, %v1182_v57 }
 0xaef   :  { %v1185_v59 = vpop.xlane.xlu1 %1184 }
 0xaf0   :  { %v1188_v60 = vsub.f32 %v1176_v53, %v1186_v58  ;;  %v1187_v23 = vmul.f32 0.015625, %v1185_v59 }
 0xaf2   :  { %v1189_v61 = vsub.f32 %v1177_v55, %v1187_v23  ;;  %v1190_v62 = vmul.f32 %v1188_v60, %v1188_v60  ;;  %v2981_v23 = vld [vmem:[%s4523_s3] ss:$0 sm:$0xff] }
 0xaf4   :  { %v1192_v20 = vsel %vm130_vm0, %v1190_v62, 0.0  ;;  %v1191_v63 = vmul.f32 %v1189_v61, %v1189_v61 }
 0xaf5   :  { %1193 = vadd.xlane.f32.xlu0 %v1192_v20 }
 0xaf6   :  { %v1195_v21 = vsel %vm130_vm0, %v1191_v63, 0.0 }
 0xaf7   :  { %1196 = vadd.xlane.f32.xlu1 %v1195_v21 }
 0xb82   :  { %v1194_v7 = vpop.xlane.xlu0 %1193 }
 0xb83   :  { %v1198_v0 = vmul.f32 0.015625, %v1194_v7 }
 0xb84   :  { %v1197_v1 = vpop.xlane.xlu1 %1196 }
 0xb85   :  { %v1200_v3 = vadd.f32 1e-12, %v1198_v0  ;;  %v1199_v8 = vmul.f32 0.015625, %v1197_v1 }
 0xb87   :  { %3765 = vrsqrt.f32 %v1200_v3  ;;  %v1201_v9 = vadd.f32 1e-12, %v1199_v8 }
 0xb89   :  { %3767 = vrsqrt.f32 %v1201_v9 }
 0xb91   :  { %v3766_v10 = vpop.eup %3765 }
 0xb92   :  { %v1204_v12 = vmul.f32 %v3766_v10, %v1188_v60 }
 0xb93   :  { %v3768_v14 = vpop.eup %3767 }
 0xb94   :  { %v1212_v15 = vmul.f32 %v2973_v11, %v1204_v12  ;;  %v1205_v17 = vmul.f32 %v3768_v14, %v1189_v61 }
 0xb96   :  { %v1213_v22 = vmul.f32 %v2973_v11, %v1205_v17  ;;  %v4232_v24 = vadd.f32 %v2974_v19, %v1212_v15  ;;  %v3689_v17 = vld [vmem:[%s3915_s14 + $0x40] sm:$0xff]  }
 0xb98   :  { %v4234_v25 = vadd.f32 %v2974_v19, %v1213_v22  ;;  %v3690_v19 = vld [vmem:[%s3935_s6 + $0x40] sm:$0xff]   ;;  %v3691_v22 = vld [vmem:[%s3915_s14 + $0x48] sm:$0xff]  }
 0xb9a   :  { %v1222_v26 = vpack.c.bf16 %v4234_v25, %v4232_v24 }
 0xb9c   :  { %3421 = vmatmul.mubr.msk.bf16.vlgmr.msra.gmra.mrb[20].mxu1 %vm130_vm0, %v1222_v26  ;;  %v3694_v26 = vld [vmem:[%s3935_s6 + $0x50] sm:$0xff]  }
 0xb9d   :  { %3452 = vmatprep.mubr.msk.bf16.mxu1 %vm3861_vm1, %v3860_v16  ;;  %3445 = vmatpush3.bf16.msra.mxu1 %v3689_v17  ;;  %v3708_v17 = vld [vmem:[%s3935_s6 + $0x78] sm:$0xff]  }
 0xb9e   :  { %3446 = vmatprep.subr.bf16.mxu1 %v3860_v16 }
 0xba1   :  { %3447 = vmatpush3.bf16.msra.mxu1 %v3691_v22 }
 0xba2   :  { %3448 = vmatprep.subr.bf16.mxu1 %v3860_v16 }
 0xc6f   :  { %v1299_v36 = vpop.f32.mrb[20].mxu1 }
 0xc70   :  { %v1300_v37 = vadd.f32 %v2975_v35, %v1299_v36  ;;  %v3422_v38 = vpop.f32.mrb[21].mxu1  ;;  %v2990_v36 = vld [vmem:[%s4524_s8] ss:$0 sm:$0xff] }
 0xc71   :  { %v1302_v39 = vpop.f32.mrb[22].mxu1 }
 0xc72   :  { %v1308_v40 = vmul.f32 0.044715, %v1300_v37  ;;  %v1303_v41 = vadd.f32 %v2975_v35, %v1302_v39  ;;  %v3423_v42 = vpop.f32.mrb[23].mxu1  ;;  %v1306_v55 = vmul.f32 0.5, %v1300_v37 }
 0xc74   :  { %v1310_v43 = vmul.f32 %v1308_v40, %v1300_v37  ;;  %v1309_v44 = vmul.f32 0.044715, %v1303_v41  ;;  %v1307_v56 = vmul.f32 0.5, %v1303_v41 }
 0xc76   :  { %v1312_v45 = vmul.f32 %v1310_v43, %v1300_v37  ;;  %v1311_v46 = vmul.f32 %v1309_v44, %v1303_v41 }
 0xc78   :  { %v1314_v47 = vadd.f32 %v1312_v45, %v1300_v37  ;;  %v1313_v48 = vmul.f32 %v1311_v46, %v1303_v41  ;;  %v3697_v45 = vld [vmem:[%s3925_s24 + $0x40] sm:$0xff]  }
 0xc7a   :  { %v1316_v49 = vmul.f32 0.7978846, %v1314_v47  ;;  %v1315_v50 = vadd.f32 %v1313_v48, %v1303_v41  ;;  %v2991_v41 = vld [vmem:[%s4525_s4] ss:$0 sm:$0xff]  ;;  %v3698_v47 = vld [vmem:[%s3925_s24 + $0x48] sm:$0xff]   ;;  %v3699_v48 = vld [vmem:[%s3925_s24 + $0x50] sm:$0xff]  }
 0xc7c   :  { %3769 = vtanh.f32 %v1316_v49  ;;  %v1317_v51 = vmul.f32 0.7978846, %v1315_v50  ;;  %v3700_v49 = vld [vmem:[%s3925_s24 + $0x58] sm:$0xff]   ;;  %v3001_v50 = vld [vmem:[%s3920_s19 + $0x2] ss:$0 sm:$0xff] }
 0xc7e   :  { %3771 = vtanh.f32 %v1317_v51 }
 0xc86   :  { %v3770_v52 = vpop.eup %3769 }
 0xc87   :  { %v1320_v53 = vadd.f32 1.0, %v3770_v52  ;;  %v3031_v52 = vld [vmem:[%s3940_s12 + $0x2] ss:$0 sm:$0xff] }
 0xc88   :  { %v3772_v54 = vpop.eup %3771 }
 0xc89   :  { %v1321_v57 = vadd.f32 1.0, %v3772_v54  ;;  %v1322_v58 = vmul.f32 %v1320_v53, %v1306_v55 }
 0xc8b   :  { %v1323_v59 = vmul.f32 %v1321_v57, %v1307_v56 }
 0xc8d   :  { %v1324_v60 = vpack.c.bf16 %v1323_v59, %v1322_v58 }
 0xc8f   :  { %3441 = vmatmul.mubr.bf16.vlgmr.msra.gmra.mrb[32].mxu0 %v1324_v60 }
 0xc90   :  { %3476 = vmatprep.mubr.msk.bf16.mxu0 %vm3861_vm1, %v3860_v16  ;;  %3469 = vmatpush3.bf16.msra.mxu0 %v3690_v19 }
 0xc91   :  { %3470 = vmatprep.subr.bf16.mxu0 %v3860_v16 }
 0xd62   :  { %v1430_v61 = vpop.f32.mrb[32].mxu0 }
 0xd63   :  { %v1431_v62 = vadd.f32 %v2981_v23, %v1430_v61  ;;  %v3442_v20 = vpop.f32.mrb[33].mxu0 }
 0xd64   :  { %v1433_v63 = vpop.f32.mrb[34].mxu0 }
 0xd65   :  { %v1434_v21 = vadd.f32 %v2981_v23, %v1433_v63  ;;  %v3443_v2 = vpop.f32.mrb[35].mxu0  ;;  %v1437_v4 = vadd.f32 %v1431_v62, %v4232_v24  ;;  %v3692_v24 = vld [vmem:[%s3935_s6 + $0x48] sm:$0xff]  }
 0xd66   :  { %3471 = vmatpush3.bf16.msra.mxu0 %v3692_v24 }
 0xd67   :  { %v1441_v5 = vsel %vm130_vm0, %v1437_v4, 0.0  ;;  %v1438_v6 = vadd.f32 %v1434_v21, %v4234_v25  ;;  %v3693_v25 = vld [vmem:[%s3915_s14 + $0x50] sm:$0xff]   ;;  %3472 = vmatprep.subr.bf16.mxu0 %v3860_v16  ;;  %v3016_v21 = vld [vmem:[%s3930_s30 + $0x2] ss:$0 sm:$0xff] }
 0xd68   :  { %1442 = vadd.xlane.f32.xlu0 %v1441_v5  ;;  %3449 = vmatpush3.bf16.msra.mxu1 %v3693_v25 }
 0xd69   :  { %v1444_v7 = vsel %vm130_vm0, %v1438_v6, 0.0  ;;  %3450 = vmatprep.subr.bf16.mxu1 %v3860_v16 }
 0xd6a   :  { %1445 = vadd.xlane.f32.xlu1 %v1444_v7  ;;  %3473 = vmatpush3.bf16.msra.mxu0 %v3694_v26 }
 0xd6b   :  { %3474 = vmatprep.subr.bf16.mxu0 %v3860_v16 }
 0xd6c   :  { %3451 = vmatpush3.bf16.msra.mxu1 %v3695_v27 }
 0xd6d   :  { %3456 = vmatprep.subr.bf16.mxu1 %v3860_v16 }
 0xd6e   :  { %3475 = vmatpush3.bf16.msra.mxu0 %v3696_v28 }
 0xd6f   :  { %3486 = vmatprep.subr.bf16.mxu0 %v3860_v16 }
 0xdf5   :  { %v1443_v0 = vpop.xlane.xlu0 %1442 }
 0xdf6   :  { %v1447_v1 = vmul.f32 0.015625, %v1443_v0 }
 0xdf7   :  { %v1446_v3 = vpop.xlane.xlu1 %1445 }
 0xdf8   :  { %v1449_v8 = vsub.f32 %v1437_v4, %v1447_v1  ;;  %v1448_v9 = vmul.f32 0.015625, %v1446_v3 }
 0xdfa   :  { %v1450_v10 = vsub.f32 %v1438_v6, %v1448_v9  ;;  %v1451_v11 = vmul.f32 %v1449_v8, %v1449_v8  ;;  %v3702_v9 = vld [vmem:[%s3915_s14 + $0x68] sm:$0xff]  }
 0xdfc   :  { %v1453_v12 = vsel %vm130_vm0, %v1451_v11, 0.0  ;;  %v1452_v14 = vmul.f32 %v1450_v10, %v1450_v10  ;;  %v3704_v11 = vld [vmem:[%s3915_s14 + $0x78] sm:$0xff]  }
 0xdfd   :  { %1454 = vadd.xlane.f32.xlu0 %v1453_v12  ;;  %v3705_v12 = vld [vmem:[%s3935_s6 + $0x60] sm:$0xff]  }
 0xdfe   :  { %v1456_v15 = vsel %vm130_vm0, %v1452_v14, 0.0  ;;  %v3706_v14 = vld [vmem:[%s3935_s6 + $0x68] sm:$0xff]  }
 0xdff   :  { %1457 = vadd.xlane.f32.xlu1 %v1456_v15  ;;  %v3707_v15 = vld [vmem:[%s3935_s6 + $0x70] sm:$0xff]  }
 0xe8a   :  { %v1455_v29 = vpop.xlane.xlu0 %1454 }
 0xe8b   :  { %v1459_v30 = vmul.f32 0.015625, %v1455_v29 }
 0xe8c   :  { %v1458_v31 = vpop.xlane.xlu1 %1457 }
 0xe8d   :  { %v1461_v32 = vadd.f32 1e-12, %v1459_v30  ;;  %v1460_v33 = vmul.f32 0.015625, %v1458_v31 }
 0xe8f   :  { %3773 = vrsqrt.f32 %v1461_v32  ;;  %v1462_v34 = vadd.f32 1e-12, %v1460_v33  ;;  %v3052_v32 = vld [vmem:[%s3920_s19 + $0x3] ss:$0 sm:$0xff]  ;;  %s3863_s19 = smov [#allocation3]  }
 0xe91   :  { %3775 = vrsqrt.f32 %v1462_v34 }
 0xe99   :  { %v3774_v35 = vpop.eup %3773 }
 0xe9a   :  { %v1465_v37 = vmul.f32 %v3774_v35, %v1449_v8  ;;  %v3701_v8 = vld [vmem:[%s3915_s14 + $0x60] sm:$0xff]  }
 0xe9b   :  { %v3776_v38 = vpop.eup %3775 }
 0xe9c   :  { %v1473_v39 = vmul.f32 %v2990_v36, %v1465_v37  ;;  %v1466_v40 = vmul.f32 %v3776_v38, %v1450_v10  ;;  %v3703_v10 = vld [vmem:[%s3915_s14 + $0x70] sm:$0xff]   ;;  %s4526_s14 = sld [smem:[#allocation16_spill]] }
 0xe9e   :  { %v1474_v42 = vmul.f32 %v2990_v36, %v1466_v40  ;;  %v4285_v43 = vadd.f32 %v2991_v41, %v1473_v39  ;;  %v3082_v40 = vld [vmem:[%s3940_s12 + $0x3] ss:$0 sm:$0xff] }
 0xea0   :  { %v4287_v44 = vadd.f32 %v2991_v41, %v1474_v42 }
 0xea2   :  { %v4292_v46 = vpack.c.bf16 %v4287_v44, %v4285_v43 }
 0xea4   :  { %3453 = vmatmul.mubr.msk.bf16.vlgmr.msra.gmra.mrb[24].mxu1 %vm130_vm0, %v4292_v46  ;;  %3477 = vmatmul.mubr.msk.bf16.vlgmr.msra.gmra.mrb[36].mxu0 %vm130_vm0, %v4292_v46 }
 0xea5   :  { %3457 = vmatpush3.bf16.msra.mxu1 %v3697_v45  ;;  %3464 = vmatprep.mubr.msk.bf16.mxu1 %vm3861_vm1, %v3860_v16 }
 0xea6   :  { %3458 = vmatprep.subr.bf16.mxu1 %v3860_v16  ;;  %3488 = vmatprep.mubr.msk.bf16.mxu0 %vm3861_vm1, %v3860_v16 }
 0xea9   :  { %3459 = vmatpush3.bf16.msra.mxu1 %v3698_v47 }
 0xeaa   :  { %3460 = vmatprep.subr.bf16.mxu1 %v3860_v16 }
 0xead   :  { %3461 = vmatpush3.bf16.msra.mxu1 %v3699_v48 }
 0xeae   :  { %3462 = vmatprep.subr.bf16.mxu1 %v3860_v16 }
 0xeb1   :  { %3463 = vmatpush3.bf16.msra.mxu1 %v3700_v49 }
 0xeb2   :  { %3480 = vmatprep.subr.bf16.mxu1 %v3860_v16 }
 0xeb4   :  { %3465 = vmatmul.mubr.msk.bf16.vlgmr.msra.gmra.mrb[28].mxu1 %vm130_vm0, %v4292_v46 }
 0xeb5   :  { %3482 = vmatprep.mubr.msk.bf16.mxu1 %vm3861_vm1, %v3860_v16 }
 0xf77   :  { %v1562_v51 = vpop.f32.mrb[24].mxu1  ;;  %v1726_v53 = vpop.f32.mrb[36].mxu0 }
 0xf78   :  { %v3454_v54 = vpop.f32.mrb[25].mxu1  ;;  %v3478_v55 = vpop.f32.mrb[37].mxu0  ;;  %v1563_v58 = vadd.f32 %v3001_v50, %v1562_v51  ;;  %v1727_v59 = vadd.f32 %v3031_v52, %v1726_v53 }
 0xf79   :  { %v1565_v56 = vpop.f32.mrb[26].mxu1  ;;  %v1729_v57 = vpop.f32.mrb[38].mxu0 }
 0xf7a   :  { %v1566_v60 = vadd.f32 %v3001_v50, %v1565_v56  ;;  %v1730_v23 = vadd.f32 %v3031_v52, %v1729_v57  ;;  %v3455_v61 = vpop.f32.mrb[27].mxu1  ;;  %v3479_v62 = vpop.f32.mrb[39].mxu0 }
 0xf7c   :  { %v1733_v20 = vpack.c.bf16 %v1566_v60, %v1563_v58  ;;  %v1809_v63 = vpack.c.bf16 %v1730_v23, %v1727_v59 }
 0xf7e   :  { %3487 = vmatpush3.bf16.msra.mxu0 %v1809_v63 }
 0xf7f   :  { %3504 = vmatprep.subr.bf16.mxu0 %v3860_v16 }
 0xf87   :  { %v1644_v2 = vpop.f32.mrb[28].mxu1 }
 0xf88   :  { %v3466_v4 = vpop.f32.mrb[29].mxu1  ;;  %v1645_v6 = vadd.f32 %v3016_v21, %v1644_v2  ;;  %v3709_v2 = vld [vmem:[%s3925_s24 + $0x60] sm:$0xff]  }
 0xf89   :  { %v1647_v5 = vpop.f32.mrb[30].mxu1 }
 0xf8a   :  { %v1648_v7 = vadd.f32 %v3016_v21, %v1647_v5  ;;  %v3467_v0 = vpop.f32.mrb[31].mxu1  ;;  %v3710_v5 = vld [vmem:[%s3925_s24 + $0x68] sm:$0xff]  }
 0xf8c   :  { %v1734_v1 = vpack.c.bf16 %v1648_v7, %v1645_v6  ;;  %v3711_v6 = vld [vmem:[%s3925_s24 + $0x70] sm:$0xff]   ;;  %v3712_v7 = vld [vmem:[%s3925_s24 + $0x78] sm:$0xff]   ;;  %s2850_s24 = sshll.u32 %s3863_s19, 4  ;;  %s2851_s24 = int_to_ptr.vmem [resolvable:$true] %s2850_s24 }
 0xf8d   :  { %p3812_p1 = scmp.lt.s32.totalorder %s2851_s24, %s2851_s24 }
 0xf8e   :  { %v1739_v3 = vsel %vm236_vm2, %v1734_v1, 0 }
 0xf8f   :  { %3481 = vmatpush3.bf16.xpose.msra.mxu1 %v1739_v3 }
 0xf90   :  { %3492 = vmatprep.subr.bf16.mxu1 %v3860_v16 }
 0xf96   :  { %3483 = vmatmul.mubr.msk.bf16.vlgmr.msra.gmra.mrb[32].mxu1 %vm236_vm2, %v1733_v20 }
 0xf97   :  { %3493 = vmatpush3.bf16.msra.mxu1 %v3701_v8  ;;  %3500 = vmatprep.mubr.msk.bf16.mxu1 %vm3861_vm1, %v3860_v16 }
 0xf98   :  { %3494 = vmatprep.subr.bf16.mxu1 %v3860_v16 }
 0xf9b   :  { %3495 = vmatpush3.bf16.msra.mxu1 %v3702_v9 }
 0xf9c   :  { %3496 = vmatprep.subr.bf16.mxu1 %v3860_v16 }
 0xf9f   :  { %3497 = vmatpush3.bf16.msra.mxu1 %v3703_v10  ;;  %v3067_v10 = vld [vmem:[%s3930_s30 + $0x3] ss:$0 sm:$0xff]  ;;  %s3807_s30 = scalar_lea.vmem %s2851_s24, 32 }
 0xfa0   :  { %3498 = vmatprep.subr.bf16.mxu1 %v3860_v16  ;;  %p3808_p0 = scmp.ne.s32.totalorder %s2851_s24, %s3807_s30  ;;  %p3813_p2 = scmp.lt.s32.totalorder %s3807_s30, %s3807_s30 }
 0xfa2   :  { %p3814_p3 = por %p3813_p2, %p3812_p1 }
 0xfa3   :  { %3499 = vmatpush3.bf16.msra.mxu1 %v3704_v11 }
 0xfa4   :  { %3516 = vmatprep.subr.bf16.mxu1 %v3860_v16  ;;  %p3815_p4 = pnand %p3814_p3, %p3808_p0 }
 0xfa6   :  { %3501 = vmatmul.mubr.msk.bf16.vlgmr.msra.gmra.mrb[36].mxu1 %vm130_vm0, %v4292_v46 }
 0xfa7   :  { %3517 = vmatpush3.bf16.msra.mxu1 %v3705_v12  ;;  %3524 = vmatprep.mubr.msk.bf16.mxu1 %vm3861_vm1, %v3860_v16 }
 0xfa8   :  { %3518 = vmatprep.subr.bf16.mxu1 %v3860_v16 }
 0xfab   :  { %3519 = vmatpush3.bf16.msra.mxu1 %v3706_v14 }
 0xfac   :  { %3520 = vmatprep.subr.bf16.mxu1 %v3860_v16 }
 0xfaf   :  { %3521 = vmatpush3.bf16.msra.mxu1 %v3707_v15 }
 0xfb0   :  { %3522 = vmatprep.subr.bf16.mxu1 %v3860_v16 }
 0xfb3   :  { %3523 = vmatpush3.bf16.msra.mxu1 %v3708_v17 }
 0xfb4   :  { %3540 = vmatprep.subr.bf16.mxu1 %v3860_v16 }
 0xfb6   :  { %3525 = vmatmul.mubr.msk.bf16.vlgmr.msra.gmra.mrb[40].mxu1 %vm130_vm0, %v4292_v46 }
 0xfb7   :  { %3544 = vmatprep.mubr.msk.bf16.mxu1 %vm3861_vm1, %v3860_v16 }
0x1069   :  { %v1775_v19 = vpop.f32.mrb[32].mxu1 }
0x106a   :  { %v1782_v22 = vmul.f32 0.17677669, %v1775_v19  ;;  %v3484_v24 = vpop.f32.mrb[33].mxu1 }
0x106b   :  { %v1778_v25 = vpop.f32.mrb[34].mxu1 }
0x106c   :  { %v1783_v26 = vmul.f32 0.17677669, %v1778_v25  ;;  %v3485_v27 = vpop.f32.mrb[35].mxu1  ;;  %v1784_v28 = vadd.f32 %v1782_v22, %v4144_v13 }
0x106e   :  { %v1786_v29 = vsel %vm608_vm3, %v1784_v28, -inf  ;;  %v1785_v30 = vadd.f32 %v1783_v26, %v4147_v18 }
0x106f   :  { %1787 = vmax.xlane.f32.xlu0 %v1786_v29 }
0x1070   :  { %v1789_v31 = vsel %vm608_vm3, %v1785_v30, -inf }
0x1071   :  { %1790 = vmax.xlane.f32.xlu1 %v1789_v31 }
0x1079   :  { %v1935_v33 = vpop.f32.mrb[36].mxu1 }
0x107a   :  { %v3502_v34 = vpop.f32.mrb[37].mxu1  ;;  %v4351_v36 = vadd.f32 %v3052_v32, %v1935_v33 }
0x107b   :  { %v1938_v35 = vpop.f32.mrb[38].mxu1 }
0x107c   :  { %v4353_v37 = vadd.f32 %v3052_v32, %v1938_v35  ;;  %v3503_v38 = vpop.f32.mrb[39].mxu1 }
0x107e   :  { %v2106_v39 = vpack.c.bf16 %v4353_v37, %v4351_v36 }
0x1089   :  { %v2099_v41 = vpop.f32.mrb[40].mxu1 }
0x108a   :  { %v3526_v42 = vpop.f32.mrb[41].mxu1  ;;  %v2100_v47 = vadd.f32 %v3082_v40, %v2099_v41 }
0x108b   :  { %v2102_v45 = vpop.f32.mrb[42].mxu1  ;;  %v3715_v42 = vld [vmem:[%s4516_s0 + $0x30] sm:$0xff]  }
0x108c   :  { %v2103_v48 = vadd.f32 %v3082_v40, %v2102_v45  ;;  %v3527_v49 = vpop.f32.mrb[43].mxu1  ;;  %3541 = vmatpush3.bf16.msra.mxu1 %v3715_v42 }
0x108d   :  { %3542 = vmatprep.subr.bf16.mxu1 %v3860_v16 }
0x108e   :  { %v2182_v50 = vpack.c.bf16 %v2103_v48, %v2100_v47 }
0x10fc   :  { %v1788_v51 = vpop.xlane.xlu0 %1787 }
0x10fd   :  { %v1792_v52 = vsub.f32 %v1784_v28, %v1788_v51 }
0x10fe   :  { %v1791_v53 = vpop.xlane.xlu1 %1790 }
0x10ff   :  { %v1794_v54 = vmul.f32 1.442695, %v1792_v52  ;;  %v1793_v55 = vsub.f32 %v1785_v30, %v1791_v53  ;;  %v3713_v52 = vld [vmem:[%s4516_s0 + $0x20] sm:$0xff]  }
0x1101   :  { %3777 = vpow2.f32 %v1794_v54  ;;  %v1796_v56 = vmul.f32 1.442695, %v1793_v55  ;;  %v3714_v54 = vld [vmem:[%s4516_s0 + $0x28] sm:$0xff]   ;;  %v3716_v55 = vld [vmem:[%s4516_s0 + $0x38] sm:$0xff]  }
0x1102   :  { %3543 = vmatpush3.bf16.msra.mxu1 %v3716_v55 }
0x1103   :  { %3779 = vpow2.f32 %v1796_v56  ;;  %3556 = vmatprep.subr.bf16.mxu1 %v3860_v16 }
0x110b   :  { %v3778_v57 = vpop.eup %3777 }
0x110c   :  { %v1798_v58 = vsel %vm608_vm3, %v3778_v57, 0.0 }
0x110d   :  { %v3780_v59 = vpop.eup %3779  ;;  %1799 = vadd.xlane.f32.xlu0 %v1798_v58 }
0x110e   :  { %v1801_v60 = vsel %vm608_vm3, %v3780_v59, 0.0 }
0x110f   :  { %1802 = vadd.xlane.f32.xlu1 %v1801_v60 }
0x119a   :  { %v1800_v23 = vpop.xlane.xlu0 %1799 }
0x119b   :  { %3781 = vrcp.f32 %v1800_v23 }
0x119c   :  { %v1803_v61 = vpop.xlane.xlu1 %1802 }
0x119d   :  { %3783 = vrcp.f32 %v1803_v61 }
0x11a5   :  { %v3782_v62 = vpop.eup %3781 }
0x11a6   :  { %v1806_v63 = vmul.f32 %v3782_v62, %v3778_v57 }
0x11a7   :  { %v3784_v20 = vpop.eup %3783 }
0x11a8   :  { %v1807_v21 = vmul.f32 %v3784_v20, %v3780_v59 }
0x11aa   :  { %v1808_v4 = vpack.c.bf16 %v1807_v21, %v1806_v63  ;;  %v3101_v21 = vld [vmem:[%s4517_s5 + $0x1] ss:$0 sm:$0xff] }
0x11ac   :  { %3489 = vmatmul.mubr.msk.bf16.vlgmr.msra.gmra.mrb[40].mxu0 %vm608_vm3, %v1808_v4 }
0x11ad   :  { %3505 = vmatpush3.bf16.msra.mxu0 %v3709_v2  ;;  %3512 = vmatprep.mubr.msk.bf16.mxu0 %vm3861_vm1, %v3860_v16 }
0x11ae   :  { %3506 = vmatprep.subr.bf16.mxu0 %v3860_v16 }
0x11b1   :  { %3507 = vmatpush3.bf16.msra.mxu0 %v3710_v5 }
0x11b2   :  { %3508 = vmatprep.subr.bf16.mxu0 %v3860_v16 }
0x11b5   :  { %3509 = vmatpush3.bf16.msra.mxu0 %v3711_v6 }
0x11b6   :  { %3510 = vmatprep.subr.bf16.mxu0 %v3860_v16 }
0x11b9   :  { %3511 = vmatpush3.bf16.msra.mxu0 %v3712_v7 }
0x11ba   :  { %3528 = vmatprep.subr.bf16.mxu0 %v3860_v16 }
0x11bc   :  { %3513 = vmatmul.mubr.msk.bf16.vlgmr.msra.gmra.mrb[44].mxu0 %vm130_vm0, %v4292_v46 }
0x11bd   :  { %3530 = vmatprep.mubr.msk.bf16.mxu0 %vm3861_vm1, %v3860_v16 }
0x127f   :  { %v4375_v0 = vpop.f32.mrb[40].mxu0 }
0x1280   :  { %v3490_v1 = vpop.f32.mrb[41].mxu0 }
0x1281   :  { %v4377_v3 = vpop.f32.mrb[42].mxu0 }
0x1282   :  { %v1854_v8 = vpack.c.bf16 %v4377_v3, %v4375_v0  ;;  %v3491_v9 = vpop.f32.mrb[43].mxu0 }
0x128f   :  { %v2017_v11 = vpop.f32.mrb[44].mxu0 }
0x1290   :  { %v3514_v12 = vpop.f32.mrb[45].mxu0  ;;  %v2018_v15 = vadd.f32 %v3067_v10, %v2017_v11 }
0x1291   :  { %v2020_v14 = vpop.f32.mrb[46].mxu0 }
0x1292   :  { %v2021_v17 = vadd.f32 %v3067_v10, %v2020_v14  ;;  %v3515_v19 = vpop.f32.mrb[47].mxu0 }
0x1294   :  { %v2107_v46 = vpack.c.bf16 %v2021_v17, %v2018_v15 }
0x1296   :  { %v2112_v22 = vsel %vm236_vm2, %v2107_v46, 0 }
0x1297   :  { %3529 = vmatpush3.bf16.xpose.msra.mxu0 %v2112_v22 }
0x1298   :  { %3534 = vmatprep.subr.bf16.mxu0 %v3860_v16 }
0x129e   :  { %3531 = vmatmul.mubr.msk.bf16.vlgmr.msra.gmra.mrb[48].mxu0 %vm236_vm2, %v2106_v39 }
0x129f   :  { %3535 = vmatpush3.bf16.msra.mxu0 %v2182_v50  ;;  %3536 = vmatprep.mubr.msk.bf16.mxu0 %vm3861_vm1, %v3860_v16 }
0x12a0   :  { %3548 = vmatprep.subr.bf16.mxu0 %v3860_v16 }
0x1371   :  { %v2148_v24 = vpop.f32.mrb[48].mxu0 }
0x1372   :  { %v2155_v25 = vmul.f32 0.17677669, %v2148_v24  ;;  %v3532_v26 = vpop.f32.mrb[49].mxu0  ;;  %v3717_v24 = vld [vmem:[%s4518_s9 + $0x20] sm:$0xff]  }
0x1373   :  { %v2151_v27 = vpop.f32.mrb[50].mxu0  ;;  %v3719_v26 = vld [vmem:[%s4518_s9 + $0x30] sm:$0xff]  }
0x1374   :  { %v2156_v28 = vmul.f32 0.17677669, %v2151_v27  ;;  %v3533_v29 = vpop.f32.mrb[51].mxu0  ;;  %v2157_v30 = vadd.f32 %v2155_v25, %v4144_v13  ;;  %v3718_v25 = vld [vmem:[%s4518_s9 + $0x28] sm:$0xff]   ;;  %v3720_v27 = vld [vmem:[%s4518_s9 + $0x38] sm:$0xff]  }
0x1376   :  { %v2159_v31 = vsel %vm608_vm3, %v2157_v30, -inf  ;;  %v2158_v32 = vadd.f32 %v2156_v28, %v4147_v18 }
0x1377   :  { %2160 = vmax.xlane.f32.xlu0 %v2159_v31 }
0x1378   :  { %v2162_v33 = vsel %vm608_vm3, %v2158_v32, -inf }
0x1379   :  { %2163 = vmax.xlane.f32.xlu1 %v2162_v33 }
0x1404   :  { %v2161_v34 = vpop.xlane.xlu0 %2160 }
0x1405   :  { %v2165_v35 = vsub.f32 %v2157_v30, %v2161_v34 }
0x1406   :  { %v2164_v36 = vpop.xlane.xlu1 %2163 }
0x1407   :  { %v2167_v37 = vmul.f32 1.442695, %v2165_v35  ;;  %v2166_v38 = vsub.f32 %v2158_v32, %v2164_v36  ;;  %v3104_v35 = vld [vmem:[%s4519_s13 + $0x1] ss:$0 sm:$0xff] }
0x1409   :  { %3785 = vpow2.f32 %v2167_v37  ;;  %v2169_v39 = vmul.f32 1.442695, %v2166_v38 }
0x140b   :  { %3787 = vpow2.f32 %v2169_v39 }
0x1413   :  { %v3786_v40 = vpop.eup %3785 }
0x1414   :  { %v2171_v13 = vsel %vm608_vm3, %v3786_v40, 0.0 }
0x1415   :  { %v3788_v41 = vpop.eup %3787  ;;  %2172 = vadd.xlane.f32.xlu0 %v2171_v13 }
0x1416   :  { %v2174_v18 = vsel %vm608_vm3, %v3788_v41, 0.0 }
0x1417   :  { %2175 = vadd.xlane.f32.xlu1 %v2174_v18 }
0x14a2   :  { %v2173_v45 = vpop.xlane.xlu0 %2172 }
0x14a3   :  { %3789 = vrcp.f32 %v2173_v45  ;;  %v3721_v45 = vld [vmem:[%s4521_s21 + $0x40] sm:$0xff]  }
0x14a4   :  { %v2176_v47 = vpop.xlane.xlu1 %2175 }
0x14a5   :  { %3791 = vrcp.f32 %v2176_v47  ;;  %v3722_v47 = vld [vmem:[%s4521_s21 + $0x48] sm:$0xff]  }
0x14ad   :  { %v3790_v48 = vpop.eup %3789 }
0x14ae   :  { %v2179_v50 = vmul.f32 %v3790_v48, %v3786_v40  ;;  %v3105_v40 = vld [vmem:[%s4520_s17 + $0x1] ss:$0 sm:$0xff]  ;;  %v3723_v48 = vld [vmem:[%s4521_s21 + $0x50] sm:$0xff]  }
0x14af   :  { %v3792_v49 = vpop.eup %3791 }
0x14b0   :  { %v2180_v51 = vmul.f32 %v3792_v49, %v3788_v41  ;;  %v3724_v49 = vld [vmem:[%s4521_s21 + $0x58] sm:$0xff]  }
0x14b2   :  { %v2181_v53 = vpack.c.bf16 %v2180_v51, %v2179_v50  ;;  %v3725_v50 = vld [vmem:[%s4521_s21 + $0x60] sm:$0xff]   ;;  %v3726_v51 = vld [vmem:[%s4521_s21 + $0x68] sm:$0xff]  }
0x14b4   :  { %3537 = vmatmul.mubr.msk.bf16.vlgmr.msra.gmra.mrb[52].mxu0 %vm608_vm3, %v2181_v53  ;;  %v3728_v53 = vld [vmem:[%s4521_s21 + $0x78] sm:$0xff]  }
0x14b5   :  { %3549 = vmatpush3.bf16.msra.mxu0 %v3713_v52  ;;  %3552 = vmatprep.mubr.msk.bf16.mxu0 %vm3861_vm1, %v3860_v16  ;;  %v3727_v52 = vld [vmem:[%s4521_s21 + $0x70] sm:$0xff]  }
0x14b6   :  { %3550 = vmatprep.subr.bf16.mxu0 %v3860_v16 }
0x14b9   :  { %3551 = vmatpush3.bf16.msra.mxu0 %v3714_v54  ;;  %v3115_v54 = vld [vmem:[%s4522_s25 + $0x1] ss:$0 sm:$0xff] }
0x14ba   :  { %3568 = vmatprep.subr.bf16.mxu0 %v3860_v16 }
0x14bc   :  { %3553 = vmatmul.mubr.msk.bf16.vlgmr.msra.gmra.mrb[56].mxu0 %vm236_vm2, %v1854_v8 }
0x14bd   :  { %3584 = vmatprep.mubr.msk.bf16.mxu0 %vm3861_vm1, %v3860_v16  ;;  %3569 = vmatpush3.bf16.msra.mxu0 %v3721_v45 }
0x14be   :  { %3570 = vmatprep.subr.bf16.mxu0 %v3860_v16 }
0x14c1   :  { %3571 = vmatpush3.bf16.msra.mxu0 %v3722_v47 }
0x14c2   :  { %3572 = vmatprep.subr.bf16.mxu0 %v3860_v16 }
0x14c5   :  { %3573 = vmatpush3.bf16.msra.mxu0 %v3723_v48 }
0x14c6   :  { %3574 = vmatprep.subr.bf16.mxu0 %v3860_v16 }
0x14c9   :  { %3575 = vmatpush3.bf16.msra.mxu0 %v3724_v49 }
0x14ca   :  { %3576 = vmatprep.subr.bf16.mxu0 %v3860_v16 }
0x14cd   :  { %3577 = vmatpush3.bf16.msra.mxu0 %v3725_v50 }
0x14ce   :  { %3578 = vmatprep.subr.bf16.mxu0 %v3860_v16 }
0x14d1   :  { %3579 = vmatpush3.bf16.msra.mxu0 %v3726_v51  ;;  %v3149_v51 = vld [vmem:[%s4524_s8 + $0x1] ss:$0 sm:$0xff] }
0x14d2   :  { %3580 = vmatprep.subr.bf16.mxu0 %v3860_v16 }
0x14d5   :  { %3581 = vmatpush3.bf16.msra.mxu0 %v3727_v52 }
0x14d6   :  { %3582 = vmatprep.subr.bf16.mxu0 %v3860_v16 }
0x14d9   :  { %3583 = vmatpush3.bf16.msra.mxu0 %v3728_v53 }
0x1587   :  { %v2220_v56 = vpop.f32.mrb[52].mxu0 }
0x1588   :  { %v3538_v57 = vpop.f32.mrb[53].mxu0 }
0x1589   :  { %v2223_v58 = vpop.f32.mrb[54].mxu0 }
0x158a   :  { %v2227_v59 = vpack.c.bf16 %v2223_v58, %v2220_v56  ;;  %v3539_v60 = vpop.f32.mrb[55].mxu0 }
0x158c   :  { %3545 = vmatmul.mubr.msk.bf16.vlgmr.msra.gmra.mrb[44].mxu1 %vm236_vm2, %v2227_v59 }
0x158d   :  { %3564 = vmatprep.mubr.msk.bf16.mxu1 %vm3861_vm1, %v3860_v16  ;;  %3557 = vmatpush3.bf16.msra.mxu1 %v3717_v24 }
0x158e   :  { %3558 = vmatprep.subr.bf16.mxu1 %v3860_v16 }
0x158f   :  { %v2338_v23 = vpop.f32.mrb[56].mxu0 }
0x1590   :  { %v3554_v61 = vpop.f32.mrb[57].mxu0 }
0x1591   :  { %v2341_v62 = vpop.f32.mrb[58].mxu0  ;;  %3559 = vmatpush3.bf16.msra.mxu1 %v3718_v25 }
0x1592   :  { %v3555_v20 = vpop.f32.mrb[59].mxu0  ;;  %3560 = vmatprep.subr.bf16.mxu1 %v3860_v16 }
0x1595   :  { %3561 = vmatpush3.bf16.msra.mxu1 %v3719_v26 }
0x1596   :  { %3562 = vmatprep.subr.bf16.mxu1 %v3860_v16 }
0x1599   :  { %3563 = vmatpush3.bf16.msra.mxu1 %v3720_v27 }
0x159a   :  { %3588 = vmatprep.subr.bf16.mxu1 %v3860_v16 }
0x165f   :  { %v2282_v63 = vpop.f32.mrb[44].mxu1 }
0x1660   :  { %v2339_v2 = vadd.f32 %v2338_v23, %v2282_v63  ;;  %v3546_v4 = vpop.f32.mrb[45].mxu1 }
0x1661   :  { %v2285_v5 = vpop.f32.mrb[46].mxu1 }
0x1662   :  { %v2353_v6 = vadd.f32 %v3101_v21, %v2339_v2  ;;  %v2342_v7 = vadd.f32 %v2341_v62, %v2285_v5  ;;  %v3547_v0 = vpop.f32.mrb[47].mxu1 }
0x1664   :  { %v2354_v1 = vadd.f32 %v3101_v21, %v2342_v7  ;;  %v2355_v3 = vadd.f32 %v2353_v6, %v4285_v43 }
0x1666   :  { %v2361_v8 = vsel %vm130_vm0, %v2355_v3, 0.0  ;;  %v2356_v9 = vadd.f32 %v2354_v1, %v4287_v44 }
0x1667   :  { %2362 = vadd.xlane.f32.xlu0 %v2361_v8 }
0x1668   :  { %v2364_v10 = vsel %vm130_vm0, %v2356_v9, 0.0 }
0x1669   :  { %2365 = vadd.xlane.f32.xlu1 %v2364_v10 }
0x16f4   :  { %v2363_v11 = vpop.xlane.xlu0 %2362 }
0x16f5   :  { %v2367_v12 = vmul.f32 0.015625, %v2363_v11 }
0x16f6   :  { %v2366_v14 = vpop.xlane.xlu1 %2365 }
0x16f7   :  { %v2369_v15 = vsub.f32 %v2355_v3, %v2367_v12  ;;  %v2368_v17 = vmul.f32 0.015625, %v2366_v14  ;;  %v3138_v14 = vld [vmem:[%s4523_s3 + $0x1] ss:$0 sm:$0xff] }
0x16f9   :  { %v2370_v19 = vsub.f32 %v2356_v9, %v2368_v17  ;;  %v2371_v46 = vmul.f32 %v2369_v15, %v2369_v15 }
0x16fb   :  { %v2373_v43 = vsel %vm130_vm0, %v2371_v46, 0.0  ;;  %v2372_v22 = vmul.f32 %v2370_v19, %v2370_v19 }
0x16fc   :  { %2374 = vadd.xlane.f32.xlu0 %v2373_v43 }
0x16fd   :  { %v2376_v44 = vsel %vm130_vm0, %v2372_v22, 0.0 }
0x16fe   :  { %2377 = vadd.xlane.f32.xlu1 %v2376_v44 }
0x1789   :  { %v2375_v28 = vpop.xlane.xlu0 %2374 }
0x178a   :  { %v2379_v29 = vmul.f32 0.015625, %v2375_v28 }
0x178b   :  { %v2378_v30 = vpop.xlane.xlu1 %2377 }
0x178c   :  { %v2381_v31 = vadd.f32 1e-12, %v2379_v29  ;;  %v2380_v32 = vmul.f32 0.015625, %v2378_v30 }
0x178e   :  { %3793 = vrsqrt.f32 %v2381_v31  ;;  %v2382_v33 = vadd.f32 1e-12, %v2380_v32 }
0x1790   :  { %3795 = vrsqrt.f32 %v2382_v33 }
0x1798   :  { %v3794_v34 = vpop.eup %3793 }
0x1799   :  { %v2385_v36 = vmul.f32 %v3794_v34, %v2369_v15 }
0x179a   :  { %v3796_v37 = vpop.eup %3795 }
0x179b   :  { %v2393_v38 = vmul.f32 %v3104_v35, %v2385_v36  ;;  %v2386_v39 = vmul.f32 %v3796_v37, %v2370_v19  ;;  %v3729_v37 = vld [vmem:[%s4526_s14] sm:$0xff]  }
0x179d   :  { %v2394_v13 = vmul.f32 %v3104_v35, %v2386_v39  ;;  %v4434_v41 = vadd.f32 %v3105_v40, %v2393_v38  ;;  %v3730_v38 = vld [vmem:[%s4526_s14 + $0x8] sm:$0xff]   ;;  %v3731_v39 = vld [vmem:[%s4526_s14 + $0x10] sm:$0xff]  }
0x179f   :  { %v4436_v18 = vadd.f32 %v3105_v40, %v2394_v13  ;;  %v3732_v40 = vld [vmem:[%s4526_s14 + $0x18] sm:$0xff]  }
0x17a1   :  { %v2403_v42 = vpack.c.bf16 %v4436_v18, %v4434_v41 }
0x17a3   :  { %3565 = vmatmul.mubr.msk.bf16.vlgmr.msra.gmra.mrb[48].mxu1 %vm130_vm0, %v2403_v42 }
0x17a4   :  { %3596 = vmatprep.mubr.msk.bf16.mxu1 %vm3861_vm1, %v3860_v16  ;;  %3589 = vmatpush3.bf16.msra.mxu1 %v3729_v37 }
0x17a5   :  { %3590 = vmatprep.subr.bf16.mxu1 %v3860_v16 }
0x17a8   :  { %3591 = vmatpush3.bf16.msra.mxu1 %v3730_v38 }
0x17a9   :  { %3592 = vmatprep.subr.bf16.mxu1 %v3860_v16 }
0x17ac   :  { %3593 = vmatpush3.bf16.msra.mxu1 %v3731_v39 }
0x17ad   :  { %3594 = vmatprep.subr.bf16.mxu1 %v3860_v16 }
0x17b0   :  { %3595 = vmatpush3.bf16.msra.mxu1 %v3732_v40 }
0x17b1   :  { %3600 = vmatprep.subr.bf16.mxu1 %v3860_v16 }
0x1876   :  { %v2482_v55 = vpop.f32.mrb[48].mxu1 }
0x1877   :  { %v2483_v56 = vadd.f32 %v3115_v54, %v2482_v55  ;;  %v3566_v57 = vpop.f32.mrb[49].mxu1  ;;  %v3150_v55 = vld [vmem:[%s4525_s4 + $0x1] ss:$0 sm:$0xff] }
0x1878   :  { %v2485_v58 = vpop.f32.mrb[50].mxu1 }
0x1879   :  { %v2491_v59 = vmul.f32 0.044715, %v2483_v56  ;;  %v2486_v60 = vadd.f32 %v3115_v54, %v2485_v58  ;;  %v3567_v23 = vpop.f32.mrb[51].mxu1  ;;  %v2489_v3 = vmul.f32 0.5, %v2483_v56 }
0x187a   :  { %v3733_v23 = vld [vmem:[%s4005_s20] sm:$0xff]  }
0x187b   :  { %v2493_v61 = vmul.f32 %v2491_v59, %v2483_v56  ;;  %v2492_v62 = vmul.f32 0.044715, %v2486_v60  ;;  %v2490_v8 = vmul.f32 0.5, %v2486_v60 }
0x187d   :  { %v2495_v20 = vmul.f32 %v2493_v61, %v2483_v56  ;;  %v2494_v63 = vmul.f32 %v2492_v62, %v2486_v60  ;;  %v3734_v61 = vld [vmem:[%s4005_s20 + $0x8] sm:$0xff]   ;;  %v3735_v62 = vld [vmem:[%s4005_s20 + $0x10] sm:$0xff]  }
0x187f   :  { %v2497_v21 = vadd.f32 %v2495_v20, %v2483_v56  ;;  %v2496_v2 = vmul.f32 %v2494_v63, %v2486_v60  ;;  %v3736_v20 = vld [vmem:[%s4005_s20 + $0x18] sm:$0xff]   ;;  %v3151_v63 = vld [vmem:[%s4000_s11] ss:$0 sm:$0xff] }
0x1881   :  { %v2499_v4 = vmul.f32 0.7978846, %v2497_v21  ;;  %v2498_v5 = vadd.f32 %v2496_v2, %v2486_v60 }
0x1883   :  { %3797 = vtanh.f32 %v2499_v4  ;;  %v2500_v6 = vmul.f32 0.7978846, %v2498_v5 }
0x1885   :  { %3799 = vtanh.f32 %v2500_v6 }
0x188d   :  { %v3798_v7 = vpop.eup %3797 }
0x188e   :  { %v2503_v0 = vadd.f32 1.0, %v3798_v7 }
0x188f   :  { %v3800_v1 = vpop.eup %3799 }
0x1890   :  { %v2504_v9 = vadd.f32 1.0, %v3800_v1  ;;  %v2505_v10 = vmul.f32 %v2503_v0, %v2489_v3  ;;  %v3157_v1 = vld [vmem:[%s4010_s26] ss:$0 sm:$0xff] }
0x1892   :  { %v2506_v11 = vmul.f32 %v2504_v9, %v2490_v8 }
0x1894   :  { %v2507_v12 = vpack.c.bf16 %v2506_v11, %v2505_v10 }
0x1896   :  { %3585 = vmatmul.mubr.bf16.vlgmr.msra.gmra.mrb[60].mxu0 %v2507_v12 }
0x1969   :  { %v2615_v15 = vpop.f32.mrb[60].mxu0 }
0x196a   :  { %v2616_v17 = vadd.f32 %v3138_v14, %v2615_v15  ;;  %v3586_v19 = vpop.f32.mrb[61].mxu0 }
0x196b   :  { %v2618_v46 = vpop.f32.mrb[62].mxu0 }
0x196c   :  { %v2619_v43 = vadd.f32 %v3138_v14, %v2618_v46  ;;  %v3587_v22 = vpop.f32.mrb[63].mxu0  ;;  %v2622_v44 = vadd.f32 %v2616_v17, %v4434_v41 }
0x196e   :  { %v2628_v24 = vsel %vm130_vm0, %v2622_v44, 0.0  ;;  %v2623_v25 = vadd.f32 %v2619_v43, %v4436_v18 }
0x196f   :  { %2629 = vadd.xlane.f32.xlu1 %v2628_v24 }
0x1970   :  { %v2631_v26 = vsel %vm130_vm0, %v2623_v25, 0.0 }
0x1971   :  { %2632 = vadd.xlane.f32.xlu0 %v2631_v26 }
0x19fc   :  { %v2630_v27 = vpop.xlane.xlu1 %2629 }
0x19fd   :  { %v2634_v28 = vmul.f32 0.015625, %v2630_v27 }
0x19fe   :  { %v2633_v29 = vpop.xlane.xlu0 %2632 }
0x19ff   :  { %v2636_v30 = vsub.f32 %v2622_v44, %v2634_v28  ;;  %v2635_v31 = vmul.f32 0.015625, %v2633_v29 }
0x1a01   :  { %v2637_v32 = vsub.f32 %v2623_v25, %v2635_v31  ;;  %v2638_v33 = vmul.f32 %v2636_v30, %v2636_v30 }
0x1a03   :  { %v2640_v34 = vsel %vm130_vm0, %v2638_v33, 0.0  ;;  %v2639_v35 = vmul.f32 %v2637_v32, %v2637_v32 }
0x1a04   :  { %2641 = vadd.xlane.f32.xlu1 %v2640_v34 }
0x1a05   :  { %v2643_v36 = vsel %vm130_vm0, %v2639_v35, 0.0 }
0x1a06   :  { %2644 = vadd.xlane.f32.xlu0 %v2643_v36 }
0x1a91   :  { %v2642_v13 = vpop.xlane.xlu1 %2641 }
0x1a92   :  { %v2646_v41 = vmul.f32 0.015625, %v2642_v13 }
0x1a93   :  { %v2645_v18 = vpop.xlane.xlu0 %2644 }
0x1a94   :  { %v2648_v42 = vadd.f32 1e-12, %v2646_v41  ;;  %v2647_v45 = vmul.f32 0.015625, %v2645_v18 }
0x1a96   :  { %3801 = vrsqrt.f32 %v2648_v42  ;;  %v2649_v47 = vadd.f32 1e-12, %v2647_v45 }
0x1a98   :  { %3803 = vrsqrt.f32 %v2649_v47 }
0x1aa0   :  { %v3802_v48 = vpop.eup %3801 }
0x1aa1   :  { %v2652_v49 = vmul.f32 %v3802_v48, %v2636_v30 }
0x1aa2   :  { %v3804_v50 = vpop.eup %3803 }
0x1aa3   :  { %v2653_v52 = vmul.f32 %v3804_v50, %v2637_v32  ;;  %v2660_v53 = vmul.f32 %v3149_v51, %v2652_v49 }
0x1aa5   :  { %v2661_v54 = vmul.f32 %v3149_v51, %v2653_v52  ;;  %v2668_v57 = vadd.f32 %v3150_v55, %v2660_v53 }
0x1aa7   :  { %v2669_v56 = vadd.f32 %v3150_v55, %v2661_v54 }
0x1aa9   :  { %v2671_v58 = vrot.slane %v2669_v56, 7 }
0x1aab   :  { %v2674_v59 = vsel %vm2673_vm4, %v2668_v57, %v2671_v58 }
0x1aac   :  { %v2675_v60 = vpack.c.bf16 %v2674_v59, %v2674_v59 }
0x1aae   :  { %3597 = vmatmul.mubr.msk.bf16.vlgmr.msra.gmra.mrb[52].mxu1 %vm130_vm0, %v2675_v60 }
0x1aaf   :  { %3608 = vmatprep.mubr.msk.bf16.mxu1 %vm3861_vm1, %v3860_v16  ;;  %3601 = vmatpush3.bf16.msra.mxu1 %v3733_v23 }
0x1ab0   :  { %3602 = vmatprep.subr.bf16.mxu1 %v3860_v16 }
0x1ab3   :  { %3603 = vmatpush3.bf16.msra.mxu1 %v3734_v61 }
0x1ab4   :  { %3604 = vmatprep.subr.bf16.mxu1 %v3860_v16 }
0x1ab7   :  { %3605 = vmatpush3.bf16.msra.mxu1 %v3735_v62 }
0x1ab8   :  { %3606 = vmatprep.subr.bf16.mxu1 %v3860_v16 }
0x1abb   :  { %3607 = vmatpush3.bf16.msra.mxu1 %v3736_v20 }
0x1b81   :  { %v2752_v21 = vpop.f32.mrb[52].mxu1 }
0x1b82   :  { %v2753_v2 = vadd.f32 %v3151_v63, %v2752_v21  ;;  %v3598_v4 = vpop.f32.mrb[53].mxu1 }
0x1b83   :  { %v2755_v5 = vpop.f32.mrb[54].mxu1 }
0x1b84   :  { %3805 = vtanh.f32 %v2753_v2  ;;  %v3599_v6 = vpop.f32.mrb[55].mxu1 }
0x1b8e   :  { %v3806_v7 = vpop.eup %3805 }
0x1b8f   :  { %v2759_v0 = vpack.c.bf16 %v3806_v7, %v3806_v7 }
0x1b91   :  { %3609 = vmatmul.mubr.msk.bf16.vlgmr.msra.gmra.mrb[56].mxu1 %vm130_vm0, %v2759_v0 }
0x1c64   :  { %v2836_v3 = vpop.f32.mrb[56].mxu1 }
0x1c65   :  { %v2837_v8 = vadd.f32 %v3157_v1, %v2836_v3  ;;  %v3610_v16 = vpop.f32.mrb[57].mxu1 }
0x1c66   :  { %v2839_v9 = vpop.f32.mrb[58].mxu1 }
0x1c67   :  { %v3611_v10 = vpop.f32.mrb[59].mxu1  ;;  %2843 = vst.msk [vmem:[#allocation3] sm:$0x3] %vm2842_vm5, %v2837_v8 }
0x1c68   :  { %3818 = shalt.err (!%p3815_p4)
}
0x1c69   :  { %s3819_s6 = scalar_lea.hbm %s4015_s2, 32 }
0x1c6a   :  { %p3820_p5 = scmp.ne.s32.totalorder %s4015_s2, %s3819_s6  ;;  %p3823_p6 = scmp.lt.u32.totalorder %s3819_s6, %s4015_s2 }
0x1c6c   :  { %p3825_p7 = pnand %p3823_p6, %p3820_p5 }
0x1c6e   :  { %3828 = shalt.err (!%p3825_p7)
}
0x1c6f   :  { %2853 = dma.vmem_to_hbm [thread:$0]  %s2851_s24, 32, %s4015_s2, [#allocation4]  }
0x1c70   :  { %3829 = dma.done.wait [#allocation4], 32  }
0x1c71   :  { %3830 = vsyncadd [#allocation4], 4294967264 }
0x1c72   :  { %2857 = vsyncpa [#allocation4], 1 }

</bundles_post_ra>
